<compile_context>
chip_gen: v6e
topology: v6e:2x2x1
jax: 0.10.0
libtpu: 0.0.40
codegen_flags: <defaults>
</compile_context>

<pallas_src>
import functools

import jax
import jax.numpy as jnp
import numpy as np
from jax.experimental import pallas as pl
from jax.experimental.pallas import tpu as pltpu

EPS = 1e-5  # nn.LayerNorm default eps


# ---------------------------------------------------------------------------
# In-kernel helpers
# ---------------------------------------------------------------------------
def _layernorm(z, gamma, beta):
    # Single centering pass; centered value reused for variance and normalize.
    mu = jnp.mean(z, axis=-1, keepdims=True)
    c = z - mu
    var = jnp.mean(c * c, axis=-1, keepdims=True)
    return c * jax.lax.rsqrt(var + EPS) * gamma + beta


# ---------------------------------------------------------------------------
# Pallas kernels
# ---------------------------------------------------------------------------
def edge_transform_kernel(x_ref, w_ref, b_ref, g_ref, beta_ref, o_ref):
    # h_e = LayerNorm(edge_attr @ W + b), one row tile per grid step.
    z = jnp.dot(x_ref[...], w_ref[...],
                preferred_element_type=jnp.float32) + b_ref[...]
    o_ref[...] = _layernorm(z, g_ref[...], beta_ref[...]).astype(o_ref.dtype)


def node_transform_kernel(pos_ref, contrib_ref, freq_ref, wsin_ref, wcos_ref,
                          b_ref, g_ref, beta_ref, o_ref):
    # Positional-encoding contribution without any lane-axis concat/tile:
    #   tile(pe, num_attr) @ W = sin(ang) @ Wpe_sin + cos(ang) @ Wpe_cos
    ang = pos_ref[...] * freq_ref[...]                       # (T,1)*(1,H/2)
    acc = jnp.dot(jnp.sin(ang), wsin_ref[...],
                  preferred_element_type=jnp.float32)
    acc = acc + jnp.dot(jnp.cos(ang), wcos_ref[...],
                        preferred_element_type=jnp.float32)
    # Attribute contribution = sum_r (emb_r @ W_r)[id_r], pre-projected and
    # summed outside the kernel, streamed in as one bf16 (T, H) tile.
    z = acc + contrib_ref[...].astype(jnp.float32) + b_ref[...]
    o_ref[...] = _layernorm(z, g_ref[...], beta_ref[...]).astype(o_ref.dtype)


# ---------------------------------------------------------------------------
# Tiling helpers
# ---------------------------------------------------------------------------
def _round_up(x, m):
    return ((x + m - 1) // m) * m


@functools.lru_cache(maxsize=None)
def _vmem_limit_bytes():
    # Generation-aware: ~96 MiB on v5e/v6e (128 MiB physical), ~48 MiB on v7x
    # (64 MiB physical per TC).  Falls back to the conservative v7x value.
    cap = 64 * 1024 * 1024
    get_info = getattr(pltpu, "get_tpu_info", None)
    if get_info is not None:
        try:
            info = get_info()
            cap = int(getattr(info, "vmem_capacity_bytes", 0)) or cap
        except Exception:
            pass
    return (cap * 3) // 4


def _pick_tile(rows, per_row_bytes, cap=16384):
    # per_row_bytes already accounts for double-buffered streams plus an
    # estimate of in-kernel f32 temporaries; keep it under ~60% of the limit.
    budget = (_vmem_limit_bytes() * 6) // 10
    t = budget // max(per_row_bytes, 1)
    t = max(16, (t // 16) * 16)          # multiple of 16 -> bf16 sublane packing
    return min(t, cap, _round_up(rows, 16))


def _cparams():
    return pltpu.CompilerParams(
        dimension_semantics=("parallel",),
        vmem_limit_bytes=_vmem_limit_bytes(),
    )


# ---------------------------------------------------------------------------
# Wrappers around pallas_call
# ---------------------------------------------------------------------------
def edge_transform(edge_attr, w, b, gamma, beta):
    E, D = edge_attr.shape
    H = w.shape[1]
    # double-buffered streams (f32 in, f32 out) + ~3 f32 (T,H) temporaries
    per_row = 2 * (4 * D + 4 * H) + 12 * H
    tile_r = _pick_tile(E, per_row)
    grid = (pl.cdiv(E, tile_r),)

    row = lambda f: pl.BlockSpec((tile_r, f), lambda i: (i, 0))
    res = lambda a: pl.BlockSpec(a.shape, lambda i: (0, 0))   # resident block

    return pl.pallas_call(
        edge_transform_kernel,
        grid=grid,
        out_shape=jax.ShapeDtypeStruct((E, H), jnp.float32),
        in_specs=[row(D), res(w), res(b), res(gamma), res(beta)],
        out_specs=row(H),
        compiler_params=_cparams(),
    )(edge_attr, w, b, gamma, beta)


def node_transform(pos, contrib, freq, wsin, wcos, b, gamma, beta):
    N = pos.shape[0]
    H = wsin.shape[1]
    # double-buffered streams (pos f32 + contrib bf16 in, f32 out) + ~5 f32
    # (T, H)-ish temporaries (ang/sin/cos/acc/z)
    per_row = 2 * (4 + 2 * H + 4 * H) + 20 * H
    tile_r = _pick_tile(N, per_row)
    grid = (pl.cdiv(N, tile_r),)

    row = lambda f: pl.BlockSpec((tile_r, f), lambda i: (i, 0))
    res = lambda a: pl.BlockSpec(a.shape, lambda i: (0, 0))   # resident block

    return pl.pallas_call(
        node_transform_kernel,
        grid=grid,
        out_shape=jax.ShapeDtypeStruct((N, H), jnp.float32),
        in_specs=[row(1), row(H), res(freq), res(wsin), res(wcos),
                  res(b), res(gamma), res(beta)],
        out_specs=row(H),
        compiler_params=_cparams(),
    )(pos, contrib, freq, wsin, wcos, b, gamma, beta)


# ---------------------------------------------------------------------------
# Parameter construction (deterministic, in-script)
# ---------------------------------------------------------------------------
def init_params(key, node_dim, edge_dim, hidden_dim, vocab=10000):
    assert hidden_dim % 2 == 0, "hidden_dim must be even for sin/cos PosEnc"
    num_attr = node_dim - 1
    keys = jax.random.split(key, 6)
    node_in = hidden_dim * num_attr if num_attr > 0 else hidden_dim
    params = {
        # AttrEmbedder: num_attr embedding tables of shape (vocab, hidden)
        "emb": [
            0.02 * jax.random.normal(jax.random.fold_in(keys[0], i),
                                     (vocab, hidden_dim), jnp.float32)
            for i in range(num_attr)
        ],
        # NodeTransform = Linear(node_in -> hidden) + LayerNorm(hidden)
        "node_w": jax.random.normal(keys[1], (node_in, hidden_dim), jnp.float32)
        / jnp.sqrt(node_in),
        "node_b": 0.01 * jax.random.normal(keys[2], (1, hidden_dim), jnp.float32),
        "node_gamma": jnp.ones((1, hidden_dim), jnp.float32),
        "node_beta": jnp.zeros((1, hidden_dim), jnp.float32),
        # EdgeTransform = Linear(edge_dim -> hidden) + LayerNorm(hidden)
        "edge_w": jax.random.normal(keys[3], (edge_dim, hidden_dim), jnp.float32)
        / jnp.sqrt(edge_dim),
        "edge_b": 0.01 * jax.random.normal(keys[4], (1, hidden_dim), jnp.float32),
        "edge_gamma": jnp.ones((1, hidden_dim), jnp.float32),
        "edge_beta": jnp.zeros((1, hidden_dim), jnp.float32),
        # PositionalEncoding frequencies (torch_geometric: logspace(0,1,H/2,1e-4))
        "freq": jnp.logspace(0.0, 1.0, hidden_dim // 2, base=1e-4)
        .astype(jnp.float32)
        .reshape(1, -1),
    }
    return params, num_attr


# ---------------------------------------------------------------------------
# Full forward (matches SecondViewPreLayer.forward)
# ---------------------------------------------------------------------------
def second_view_pre_layer(params, x_t, edge_attr_t, num_attr, hidden_dim):
    # h_e = EdgeTransform(edge_attr_t)
    h_e = edge_transform(
        edge_attr_t.astype(jnp.float32),
        params["edge_w"], params["edge_b"],
        params["edge_gamma"], params["edge_beta"],
    )

    H = hidden_dim
    pos = x_t[:, 0:1].astype(jnp.float32)          # (N, 1) positions for PosEnc
    node_w = params["node_w"]

    if num_attr > 0:
        # Split W into per-attribute (H, H) blocks; the PE weight is their sum.
        w_blocks = [node_w[r * H:(r + 1) * H, :] for r in range(num_attr)]
        w_pe = functools.reduce(jnp.add, w_blocks)
        # TODO(synk): no general VMEM gather in Pallas TPU for a (10000, H)
        # embedding table; instead pre-multiply each table by its weight block
        # and let ONE XLA fusion gather + sum the per-row contributions into a
        # single bf16 (N, H) stream feeding the kernel (no per-attr matmuls in
        # kernel, no per-attr (N, H) HBM round-trips).
        contrib = None
        for r in range(num_attr):
            tbl = jnp.dot(params["emb"][r], w_blocks[r],
                          preferred_element_type=jnp.float32).astype(jnp.bfloat16)
            g = tbl[x_t[:, r + 1]]
            contrib = g if contrib is None else contrib + g
    else:
        w_pe = node_w
        contrib = jnp.zeros((x_t.shape[0], H), jnp.bfloat16)

    wsin = w_pe[: H // 2, :]
    wcos = w_pe[H // 2:, :]

    h_x = node_transform(
        pos, contrib, params["freq"], wsin, wcos,
        params["node_b"], params["node_gamma"], params["node_beta"],
    )
    return h_x, h_e


# ---------------------------------------------------------------------------
# Pure-JAX reference (matches the PyTorch module literally)
# ---------------------------------------------------------------------------
def _reference(params, x_t, edge_attr_t, num_attr, hidden_dim):
    def ln(z, g, b):
        mu = z.mean(-1, keepdims=True)
        var = ((z - mu) ** 2).mean(-1, keepdims=True)
        return (z - mu) / jnp.sqrt(var + EPS) * g + b

    h_e = ln(edge_attr_t.astype(jnp.float32) @ params["edge_w"] + params["edge_b"],
             params["edge_gamma"], params["edge_beta"])

    pos = x_t[:, 0:1].astype(jnp.float32)
    ang = pos * params["freq"]
    pe = jnp.concatenate([jnp.sin(ang), jnp.cos(ang)], axis=-1)
    if num_attr > 0:
        pe = jnp.tile(pe, (1, num_attr))
        embs = [params["emb"][r][x_t[:, r + 1]] for r in range(num_attr)]
        node_emb = jnp.concatenate(embs, axis=1) + pe
    else:
        node_emb = pe
    h_x = ln(node_emb @ params["node_w"] + params["node_b"],
             params["node_gamma"], params["node_beta"])
    return h_x, h_e


# ---------------------------------------------------------------------------
if __name__ == "__main__":
    node_dim, edge_dim, hidden_dim = 3, 4, 64      # num_attr = 2 (module default H)
    N, E = 64, 96

    key = jax.random.PRNGKey(0)
    k_param, k_x, k_e = jax.random.split(key, 3)

    params, num_attr = init_params(k_param, node_dim, edge_dim, hidden_dim)

    # x_t: column 0 = event ordering (position), columns 1.. = attribute ids
    attr_ids = jax.random.randint(k_x, (N, node_dim - 1), 0, 10000, dtype=jnp.int32)
    x_t = jnp.concatenate([jnp.arange(N, dtype=jnp.int32)[:, None], attr_ids], axis=1)
    edge_attr_t = jax.random.normal(k_e, (E, edge_dim), dtype=jnp.float32)

    fwd = jax.jit(functools.partial(second_view_pre_layer,
                                    num_attr=num_attr, hidden_dim=hidden_dim))
    h_x, h_e = fwd(params, x_t, edge_attr_t)
    jax.block_until_ready((h_x, h_e))

    assert h_x.shape == (N, hidden_dim) and h_e.shape == (E, hidden_dim)

    # Numerical check against the straightforward JAX reference.  Both sides
    # use the TPU MXU (bf16-truncated f32 inputs) but with different operand
    # groupings, plus the kernel streams the attribute contribution in bf16,
    # so allow a small tolerance (much tighter than the previous 0.1).
    r_x, r_e = _reference(params, x_t, edge_attr_t, num_attr, hidden_dim)
    assert np.allclose(np.asarray(h_e), np.asarray(r_e), atol=2e-2, rtol=2e-2)
    assert np.allclose(np.asarray(h_x), np.asarray(r_x), atol=2e-2, rtol=2e-2)

    print("KERNEL_OK")
</pallas_src>

<mosaic_0001>
module attributes {stable_mosaic.version = 11 : i64} {
  func.func @node_transform_kernel(%arg0: i32, %arg1: memref<64x1xf32, #tpu.memory_space<vmem>>, %arg2: memref<64x64xbf16, #tpu.memory_space<vmem>>, %arg3: memref<1x32xf32, #tpu.memory_space<vmem>>, %arg4: memref<32x64xf32, #tpu.memory_space<vmem>>, %arg5: memref<32x64xf32, #tpu.memory_space<vmem>>, %arg6: memref<1x64xf32, #tpu.memory_space<vmem>>, %arg7: memref<1x64xf32, #tpu.memory_space<vmem>>, %arg8: memref<1x64xf32, #tpu.memory_space<vmem>>, %arg9: memref<64x64xf32, #tpu.memory_space<vmem>>) attributes {dimension_semantics = [#tpu.dimension_semantics<parallel>], iteration_bounds = array<i64: 1>, scalar_prefetch = 0 : i64, scratch_operands = 0 : i64, tpu.core_type = #tpu.core_type<tc>, window_params = [{transform_indices = @transform_0, window_bounds = array<i64: 64, 1>}, {transform_indices = @transform_1, window_bounds = array<i64: 64, 64>}, {pipeline_mode = #tpu.pipeline_mode<synchronous>, transform_indices = @transform_2, window_bounds = array<i64: 1, 32>}, {pipeline_mode = #tpu.pipeline_mode<synchronous>, transform_indices = @transform_3, window_bounds = array<i64: 32, 64>}, {pipeline_mode = #tpu.pipeline_mode<synchronous>, transform_indices = @transform_4, window_bounds = array<i64: 32, 64>}, {pipeline_mode = #tpu.pipeline_mode<synchronous>, transform_indices = @transform_5, window_bounds = array<i64: 1, 64>}, {pipeline_mode = #tpu.pipeline_mode<synchronous>, transform_indices = @transform_6, window_bounds = array<i64: 1, 64>}, {pipeline_mode = #tpu.pipeline_mode<synchronous>, transform_indices = @transform_7, window_bounds = array<i64: 1, 64>}, {transform_indices = @transform_8, window_bounds = array<i64: 64, 64>}]} {
    %c0 = arith.constant 0 : index
    %c0_0 = arith.constant 0 : index
    %0 = vector.load %arg1[%c0, %c0_0] : memref<64x1xf32, #tpu.memory_space<vmem>>, vector<64x1xf32>
    %c0_1 = arith.constant 0 : index
    %c0_2 = arith.constant 0 : index
    %1 = vector.load %arg3[%c0_1, %c0_2] : memref<1x32xf32, #tpu.memory_space<vmem>>, vector<1x32xf32>
    %2 = vector.broadcast %0 : vector<64x1xf32> to vector<64x32xf32>
    %3 = vector.broadcast %1 : vector<1x32xf32> to vector<64x32xf32>
    %4 = arith.mulf %2, %3 : vector<64x32xf32>
    %5 = math.sin %4 : vector<64x32xf32>
    %c0_3 = arith.constant 0 : index
    %c0_4 = arith.constant 0 : index
    %6 = vector.load %arg4[%c0_3, %c0_4] : memref<32x64xf32, #tpu.memory_space<vmem>>, vector<32x64xf32>
    %cst = arith.constant dense<0.000000e+00> : vector<64x64xf32>
    %7 = tpu.matmul %5, %6, %cst {dimension_numbers = #tpu.dot_dimension_numbers<[1], [0], [0], [1], [0, 0, 1, 1], [], []>} : vector<64x32xf32>, vector<32x64xf32>, vector<64x64xf32> -> vector<64x64xf32>
    %8 = math.cos %4 : vector<64x32xf32>
    %c0_5 = arith.constant 0 : index
    %c0_6 = arith.constant 0 : index
    %9 = vector.load %arg5[%c0_5, %c0_6] : memref<32x64xf32, #tpu.memory_space<vmem>>, vector<32x64xf32>
    %cst_7 = arith.constant dense<0.000000e+00> : vector<64x64xf32>
    %10 = tpu.matmul %8, %9, %cst_7 {dimension_numbers = #tpu.dot_dimension_numbers<[1], [0], [0], [1], [0, 0, 1, 1], [], []>} : vector<64x32xf32>, vector<32x64xf32>, vector<64x64xf32> -> vector<64x64xf32>
    %11 = arith.addf %7, %10 : vector<64x64xf32>
    %c0_8 = arith.constant 0 : index
    %c0_9 = arith.constant 0 : index
    %12 = vector.load %arg2[%c0_8, %c0_9] : memref<64x64xbf16, #tpu.memory_space<vmem>>, vector<64x64xbf16>
    %13 = arith.extf %12 : vector<64x64xbf16> to vector<64x64xf32>
    %14 = arith.addf %11, %13 : vector<64x64xf32>
    %c0_10 = arith.constant 0 : index
    %c0_11 = arith.constant 0 : index
    %15 = vector.load %arg6[%c0_10, %c0_11] : memref<1x64xf32, #tpu.memory_space<vmem>>, vector<1x64xf32>
    %16 = vector.broadcast %15 : vector<1x64xf32> to vector<64x64xf32>
    %17 = arith.addf %14, %16 : vector<64x64xf32>
    %c0_12 = arith.constant 0 : index
    %c0_13 = arith.constant 0 : index
    %18 = vector.load %arg7[%c0_12, %c0_13] : memref<1x64xf32, #tpu.memory_space<vmem>>, vector<1x64xf32>
    %c0_14 = arith.constant 0 : index
    %c0_15 = arith.constant 0 : index
    %19 = vector.load %arg8[%c0_14, %c0_15] : memref<1x64xf32, #tpu.memory_space<vmem>>, vector<1x64xf32>
    %cst_16 = arith.constant dense<0.000000e+00> : vector<64xf32>
    %20 = vector.multi_reduction <add>, %17, %cst_16 [1] : vector<64x64xf32> to vector<64xf32>
    %21 = vector.shape_cast %20 : vector<64xf32> to vector<64x1xf32>
    %cst_17 = arith.constant 6.400000e+01 : f32
    %22 = vector.broadcast %cst_17 : f32 to vector<64x1xf32>
    %23 = arith.divf %21, %22 : vector<64x1xf32>
    %24 = vector.broadcast %23 : vector<64x1xf32> to vector<64x64xf32>
    %25 = arith.subf %17, %24 : vector<64x64xf32>
    %26 = arith.mulf %25, %25 : vector<64x64xf32>
    %cst_18 = arith.constant dense<0.000000e+00> : vector<64xf32>
    %27 = vector.multi_reduction <add>, %26, %cst_18 [1] : vector<64x64xf32> to vector<64xf32>
    %28 = vector.shape_cast %27 : vector<64xf32> to vector<64x1xf32>
    %cst_19 = arith.constant 6.400000e+01 : f32
    %29 = vector.broadcast %cst_19 : f32 to vector<64x1xf32>
    %30 = arith.divf %28, %29 : vector<64x1xf32>
    %cst_20 = arith.constant 9.99999974E-6 : f32
    %31 = vector.broadcast %cst_20 : f32 to vector<64x1xf32>
    %32 = arith.addf %30, %31 : vector<64x1xf32>
    %33 = math.rsqrt %32 : vector<64x1xf32>
    %34 = vector.broadcast %33 : vector<64x1xf32> to vector<64x64xf32>
    %35 = arith.mulf %25, %34 : vector<64x64xf32>
    %36 = vector.broadcast %18 : vector<1x64xf32> to vector<64x64xf32>
    %37 = arith.mulf %35, %36 : vector<64x64xf32>
    %38 = vector.broadcast %19 : vector<1x64xf32> to vector<64x64xf32>
    %39 = arith.addf %37, %38 : vector<64x64xf32>
    %c0_21 = arith.constant 0 : index
    %c0_22 = arith.constant 0 : index
    %40 = vector.load %arg9[%c0_21, %c0_22] : memref<64x64xf32, #tpu.memory_space<vmem>>, vector<64x64xf32>
    tpu.vector_store %arg9[%c0_21, %c0_22], %39 {strides = array<i32>} : memref<64x64xf32, #tpu.memory_space<vmem>>, vector<64x64xf32>,
    return
  }
  func.func @transform_0(%arg0: i32) -> (i32, i32) {
    %c0_i32 = arith.constant 0 : i32
    %c0_i32_0 = arith.constant 0 : i32
    return %arg0, %c0_i32 : i32, i32
  }
  func.func @transform_1(%arg0: i32) -> (i32, i32) {
    %c0_i32 = arith.constant 0 : i32
    %c0_i32_0 = arith.constant 0 : i32
    return %arg0, %c0_i32 : i32, i32
  }
  func.func @transform_2(%arg0: i32) -> (i32, i32) {
    %c0_i32 = arith.constant 0 : i32
    %c0_i32_0 = arith.constant 0 : i32
    %c0_i32_1 = arith.constant 0 : i32
    return %c0_i32, %c0_i32_0 : i32, i32
  }
  func.func @transform_3(%arg0: i32) -> (i32, i32) {
    %c0_i32 = arith.constant 0 : i32
    %c0_i32_0 = arith.constant 0 : i32
    %c0_i32_1 = arith.constant 0 : i32
    return %c0_i32, %c0_i32_0 : i32, i32
  }
  func.func @transform_4(%arg0: i32) -> (i32, i32) {
    %c0_i32 = arith.constant 0 : i32
    %c0_i32_0 = arith.constant 0 : i32
    %c0_i32_1 = arith.constant 0 : i32
    return %c0_i32, %c0_i32_0 : i32, i32
  }
  func.func @transform_5(%arg0: i32) -> (i32, i32) {
    %c0_i32 = arith.constant 0 : i32
    %c0_i32_0 = arith.constant 0 : i32
    %c0_i32_1 = arith.constant 0 : i32
    return %c0_i32, %c0_i32_0 : i32, i32
  }
  func.func @transform_6(%arg0: i32) -> (i32, i32) {
    %c0_i32 = arith.constant 0 : i32
    %c0_i32_0 = arith.constant 0 : i32
    %c0_i32_1 = arith.constant 0 : i32
    return %c0_i32, %c0_i32_0 : i32, i32
  }
  func.func @transform_7(%arg0: i32) -> (i32, i32) {
    %c0_i32 = arith.constant 0 : i32
    %c0_i32_0 = arith.constant 0 : i32
    %c0_i32_1 = arith.constant 0 : i32
    return %c0_i32, %c0_i32_0 : i32, i32
  }
  func.func @transform_8(%arg0: i32) -> (i32, i32) {
    %c0_i32 = arith.constant 0 : i32
    %c0_i32_0 = arith.constant 0 : i32
    return %arg0, %c0_i32 : i32, i32
  }
}

module attributes {stable_mosaic.version = 11 : i64} {
  func.func @edge_transform_kernel(%arg0: i32, %arg1: memref<96x4xf32, #tpu.memory_space<vmem>>, %arg2: memref<4x64xf32, #tpu.memory_space<vmem>>, %arg3: memref<1x64xf32, #tpu.memory_space<vmem>>, %arg4: memref<1x64xf32, #tpu.memory_space<vmem>>, %arg5: memref<1x64xf32, #tpu.memory_space<vmem>>, %arg6: memref<96x64xf32, #tpu.memory_space<vmem>>) attributes {dimension_semantics = [#tpu.dimension_semantics<parallel>], iteration_bounds = array<i64: 1>, scalar_prefetch = 0 : i64, scratch_operands = 0 : i64, tpu.core_type = #tpu.core_type<tc>, window_params = [{transform_indices = @transform_0, window_bounds = array<i64: 96, 4>}, {pipeline_mode = #tpu.pipeline_mode<synchronous>, transform_indices = @transform_1, window_bounds = array<i64: 4, 64>}, {pipeline_mode = #tpu.pipeline_mode<synchronous>, transform_indices = @transform_2, window_bounds = array<i64: 1, 64>}, {pipeline_mode = #tpu.pipeline_mode<synchronous>, transform_indices = @transform_3, window_bounds = array<i64: 1, 64>}, {pipeline_mode = #tpu.pipeline_mode<synchronous>, transform_indices = @transform_4, window_bounds = array<i64: 1, 64>}, {transform_indices = @transform_5, window_bounds = array<i64: 96, 64>}]} {
    %c0 = arith.constant 0 : index
    %c0_0 = arith.constant 0 : index
    %0 = vector.load %arg1[%c0, %c0_0] : memref<96x4xf32, #tpu.memory_space<vmem>>, vector<96x4xf32>
    %c0_1 = arith.constant 0 : index
    %c0_2 = arith.constant 0 : index
    %1 = vector.load %arg2[%c0_1, %c0_2] : memref<4x64xf32, #tpu.memory_space<vmem>>, vector<4x64xf32>
    %cst = arith.constant dense<0.000000e+00> : vector<96x64xf32>
    %2 = tpu.matmul %0, %1, %cst {dimension_numbers = #tpu.dot_dimension_numbers<[1], [0], [0], [1], [0, 0, 1, 1], [], []>} : vector<96x4xf32>, vector<4x64xf32>, vector<96x64xf32> -> vector<96x64xf32>
    %c0_3 = arith.constant 0 : index
    %c0_4 = arith.constant 0 : index
    %3 = vector.load %arg3[%c0_3, %c0_4] : memref<1x64xf32, #tpu.memory_space<vmem>>, vector<1x64xf32>
    %4 = vector.broadcast %3 : vector<1x64xf32> to vector<96x64xf32>
    %5 = arith.addf %2, %4 : vector<96x64xf32>
    %c0_5 = arith.constant 0 : index
    %c0_6 = arith.constant 0 : index
    %6 = vector.load %arg4[%c0_5, %c0_6] : memref<1x64xf32, #tpu.memory_space<vmem>>, vector<1x64xf32>
    %c0_7 = arith.constant 0 : index
    %c0_8 = arith.constant 0 : index
    %7 = vector.load %arg5[%c0_7, %c0_8] : memref<1x64xf32, #tpu.memory_space<vmem>>, vector<1x64xf32>
    %cst_9 = arith.constant dense<0.000000e+00> : vector<96xf32>
    %8 = vector.multi_reduction <add>, %5, %cst_9 [1] : vector<96x64xf32> to vector<96xf32>
    %9 = vector.shape_cast %8 : vector<96xf32> to vector<96x1xf32>
    %cst_10 = arith.constant 6.400000e+01 : f32
    %10 = vector.broadcast %cst_10 : f32 to vector<96x1xf32>
    %11 = arith.divf %9, %10 : vector<96x1xf32>
    %12 = vector.broadcast %11 : vector<96x1xf32> to vector<96x64xf32>
    %13 = arith.subf %5, %12 : vector<96x64xf32>
    %14 = arith.mulf %13, %13 : vector<96x64xf32>
    %cst_11 = arith.constant dense<0.000000e+00> : vector<96xf32>
    %15 = vector.multi_reduction <add>, %14, %cst_11 [1] : vector<96x64xf32> to vector<96xf32>
    %16 = vector.shape_cast %15 : vector<96xf32> to vector<96x1xf32>
    %cst_12 = arith.constant 6.400000e+01 : f32
    %17 = vector.broadcast %cst_12 : f32 to vector<96x1xf32>
    %18 = arith.divf %16, %17 : vector<96x1xf32>
    %cst_13 = arith.constant 9.99999974E-6 : f32
    %19 = vector.broadcast %cst_13 : f32 to vector<96x1xf32>
    %20 = arith.addf %18, %19 : vector<96x1xf32>
    %21 = math.rsqrt %20 : vector<96x1xf32>
    %22 = vector.broadcast %21 : vector<96x1xf32> to vector<96x64xf32>
    %23 = arith.mulf %13, %22 : vector<96x64xf32>
    %24 = vector.broadcast %6 : vector<1x64xf32> to vector<96x64xf32>
    %25 = arith.mulf %23, %24 : vector<96x64xf32>
    %26 = vector.broadcast %7 : vector<1x64xf32> to vector<96x64xf32>
    %27 = arith.addf %25, %26 : vector<96x64xf32>
    %c0_14 = arith.constant 0 : index
    %c0_15 = arith.constant 0 : index
    %28 = vector.load %arg6[%c0_14, %c0_15] : memref<96x64xf32, #tpu.memory_space<vmem>>, vector<96x64xf32>
    tpu.vector_store %arg6[%c0_14, %c0_15], %27 {strides = array<i32>} : memref<96x64xf32, #tpu.memory_space<vmem>>, vector<96x64xf32>,
    return
  }
  func.func @transform_0(%arg0: i32) -> (i32, i32) {
    %c0_i32 = arith.constant 0 : i32
    %c0_i32_0 = arith.constant 0 : i32
    return %arg0, %c0_i32 : i32, i32
  }
  func.func @transform_1(%arg0: i32) -> (i32, i32) {
    %c0_i32 = arith.constant 0 : i32
    %c0_i32_0 = arith.constant 0 : i32
    %c0_i32_1 = arith.constant 0 : i32
    return %c0_i32, %c0_i32_0 : i32, i32
  }
  func.func @transform_2(%arg0: i32) -> (i32, i32) {
    %c0_i32 = arith.constant 0 : i32
    %c0_i32_0 = arith.constant 0 : i32
    %c0_i32_1 = arith.constant 0 : i32
    return %c0_i32, %c0_i32_0 : i32, i32
  }
  func.func @transform_3(%arg0: i32) -> (i32, i32) {
    %c0_i32 = arith.constant 0 : i32
    %c0_i32_0 = arith.constant 0 : i32
    %c0_i32_1 = arith.constant 0 : i32
    return %c0_i32, %c0_i32_0 : i32, i32
  }
  func.func @transform_4(%arg0: i32) -> (i32, i32) {
    %c0_i32 = arith.constant 0 : i32
    %c0_i32_0 = arith.constant 0 : i32
    %c0_i32_1 = arith.constant 0 : i32
    return %c0_i32, %c0_i32_0 : i32, i32
  }
  func.func @transform_5(%arg0: i32) -> (i32, i32) {
    %c0_i32 = arith.constant 0 : i32
    %c0_i32_0 = arith.constant 0 : i32
    return %arg0, %c0_i32 : i32, i32
  }
}

</mosaic_0001>

<bundles_post_ra>
// kernel: second_view_pre_layer.2
= control target key start
LH: loop header
LB: loop body
LE: loop exit
PB: predicated region body
PF: predicated region fallthrough
CT: control target
= control target key end

     0   :  { %vm77_vm0 = vcmask 1043456   ;;  %vm40_vm1 = vcmask 31744   ;;  %vm208_vm2 = vcmask 523264   ;;  %s759_s1 = inlined_call_operand.vmem [shape: f32[4,64], index: 1, kind: input, shape index: {}]   ;;  %s760_s0 = inlined_call_operand.vmem [shape: f32[96,4], index: 0, kind: input, shape index: {}]   ;;  %s761_s2 = inlined_call_operand.vmem [shape: f32[1,64], index: 2, kind: input, shape index: {}]   ;;  %s762_s3 = inlined_call_operand.vmem [shape: f32[1,64], index: 3, kind: input, shape index: {}]   ;;  %s763_s4 = inlined_call_operand.vmem [shape: f32[1,64], index: 4, kind: input, shape index: {}]   ;;  %s764_s5 = inlined_call_operand.vmem [shape: f32[96,64], index: 5, kind: output, shape index: {}]  }
   0x1   :  { %v32_v0 = vld [vmem:[%s759_s1] sm:$0xf]  ;;  %v26_v2 = vld [vmem:[%s760_s0 + $0x30] sm:$0xff]  ;;  %v21_v3 = vld [vmem:[%s760_s0 + $0x8] sm:$0xff] }
   0x2   :  { %v20_v1 = vld [vmem:[%s760_s0] sm:$0xff]  ;;  %447 = vmatprep.subr.msk.mxu0 %vm77_vm0, %v32_v0  ;;  %467 = vmatprep.subr.msk.mxu1 %vm77_vm0, %v32_v0  ;;  %v27_v4 = vld [vmem:[%s760_s0 + $0x38] sm:$0xff]  ;;  %v22_v5 = vld [vmem:[%s760_s0 + $0x10] sm:$0xff] }
   0x3   :  { %448 = vmatpush3.msk.msra.mxu0 %vm77_vm0, %v32_v0  ;;  %468 = vmatpush3.msk.msra.mxu1 %vm77_vm0, %v32_v0  ;;  %v28_v6 = vld [vmem:[%s760_s0 + $0x40] sm:$0xff]  ;;  %v23_v7 = vld [vmem:[%s760_s0 + $0x18] sm:$0xff]  ;;  %v29_v8 = vld [vmem:[%s760_s0 + $0x48] sm:$0xff] }
   0x4   :  { %449 = vmatprep.mubr.msk.f32.mxu0 %vm40_vm1, %v20_v1  ;;  %458 = vmatprep.mubr.msk.f32.mxu1 %vm40_vm1, %v26_v2  ;;  %v24_v9 = vld [vmem:[%s760_s0 + $0x20] sm:$0xff]  ;;  %v30_v10 = vld [vmem:[%s760_s0 + $0x50] sm:$0xff]  ;;  %v25_v11 = vld [vmem:[%s760_s0 + $0x28] sm:$0xff] }
   0x5   :  { %450 = vmatmul.mubr.msk.f32.vlgmr.msra.gmra.mxu0 %vm40_vm1, %v21_v3  ;;  %459 = vmatmul.mubr.msk.f32.vlgmr.msra.gmra.mxu1 %vm40_vm1, %v27_v4  ;;  %v31_v12 = vld [vmem:[%s760_s0 + $0x58] sm:$0xff]  ;;  %v418_v13 = vld [vmem:[%s761_s2] ss:$0 sm:$0xff] }
   0x6   :  { %452 = vmatprep.mubr.msk.f32.mxu0 %vm40_vm1, %v22_v5  ;;  %461 = vmatprep.mubr.msk.f32.mxu1 %vm40_vm1, %v28_v6 }
   0x9   :  { %453 = vmatmul.mubr.msk.f32.gmra.mxu0 %vm40_vm1, %v23_v7  ;;  %462 = vmatmul.mubr.msk.f32.gmra.mxu1 %vm40_vm1, %v29_v8 }
   0xa   :  { %455 = vmatprep.mubr.msk.f32.mxu0 %vm40_vm1, %v24_v9  ;;  %464 = vmatprep.mubr.msk.f32.mxu1 %vm40_vm1, %v30_v10 }
   0xd   :  { %456 = vmatmul.mubr.msk.f32.gmra.mxu0 %vm40_vm1, %v25_v11  ;;  %465 = vmatmul.mubr.msk.f32.gmra.mxu1 %vm40_vm1, %v31_v12 }
  0xc5   :  { %v451_v14 = vpop.f32.mrf.mxu0  ;;  %v460_v15 = vpop.f32.mrf.mxu1 }
  0xc6   :  { %v153_v16 = vadd.f32 %v451_v14, %v418_v13  ;;  %v183_v17 = vadd.f32 %v460_v15, %v418_v13 }
  0xc7   :  { %v147_v18 = vpop.f32.mrf.mxu0  ;;  %v177_v19 = vpop.f32.mrf.mxu1 }
  0xc8   :  { %v148_v20 = vadd.f32 %v418_v13, %v147_v18  ;;  %v230_v21 = vsel %vm208_vm2, %v183_v17, 0.0  ;;  %v212_v22 = vsel %vm208_vm2, %v153_v16, 0.0  ;;  %v178_v28 = vadd.f32 %v418_v13, %v177_v19 }
  0xc9   :  { %231 = vadd.xlane.f32.xlu1 %v230_v21  ;;  %213 = vadd.xlane.f32.xlu0 %v212_v22  ;;  %v454_v23 = vpop.f32.mrf.mxu0  ;;  %v463_v24 = vpop.f32.mrf.mxu1 }
  0xca   :  { %v163_v25 = vadd.f32 %v454_v23, %v418_v13  ;;  %v193_v26 = vadd.f32 %v463_v24, %v418_v13  ;;  %v209_v30 = vsel %vm208_vm2, %v148_v20, 0.0  ;;  %v227_v38 = vsel %vm208_vm2, %v178_v28, 0.0 }
  0xcb   :  { %v157_v27 = vpop.f32.mrf.mxu0  ;;  %v187_v31 = vpop.f32.mrf.mxu1 }
  0xcc   :  { %v218_v29 = vsel %vm208_vm2, %v163_v25, 0.0  ;;  %v236_v33 = vsel %vm208_vm2, %v193_v26, 0.0  ;;  %v158_v36 = vadd.f32 %v418_v13, %v157_v27  ;;  %v188_v37 = vadd.f32 %v418_v13, %v187_v31 }
  0xcd   :  { %219 = vadd.xlane.f32.xlu1 %v218_v29  ;;  %210 = vadd.xlane.f32.xlu0 %v209_v30  ;;  %v457_v32 = vpop.f32.mrf.mxu0  ;;  %v466_v35 = vpop.f32.mrf.mxu1 }
  0xce   :  { %v583_v39 = vadd.f32 %v457_v32, %v418_v13  ;;  %v215_v42 = vsel %vm208_vm2, %v158_v36, 0.0  ;;  %v233_v43 = vsel %vm208_vm2, %v188_v37, 0.0  ;;  %v589_v44 = vadd.f32 %v466_v35, %v418_v13 }
  0xcf   :  { %v167_v34 = vpop.f32.mrf.mxu0  ;;  %v197_v41 = vpop.f32.mrf.mxu1 }
  0xd0   :  { %v585_v40 = vadd.f32 %v418_v13, %v167_v34  ;;  %v591_v45 = vadd.f32 %v418_v13, %v197_v41  ;;  %v224_v46 = vsel %vm208_vm2, %v583_v39, 0.0  ;;  %v242_v48 = vsel %vm208_vm2, %v589_v44, 0.0 }
  0xd1   :  { %237 = vadd.xlane.f32.xlu1 %v236_v33  ;;  %228 = vadd.xlane.f32.xlu0 %v227_v38 }
  0xd2   :  { %v221_v47 = vsel %vm208_vm2, %v585_v40, 0.0  ;;  %v239_v49 = vsel %vm208_vm2, %v591_v45, 0.0 }
  0xd5   :  { %216 = vadd.xlane.f32.xlu1 %v215_v42  ;;  %234 = vadd.xlane.f32.xlu0 %v233_v43 }
  0xd9   :  { %225 = vadd.xlane.f32.xlu1 %v224_v46  ;;  %222 = vadd.xlane.f32.xlu0 %v221_v47 }
  0xdd   :  { %243 = vadd.xlane.f32.xlu1 %v242_v48  ;;  %240 = vadd.xlane.f32.xlu0 %v239_v49 }
 0x152   :  { %v232_v50 = vpop.xlane.xlu1 %231  ;;  %v214_v51 = vpop.xlane.xlu0 %213 }
 0x153   :  { %v253_v52 = vmul.f32 0.015625, %v232_v50  ;;  %v247_v53 = vmul.f32 0.015625, %v214_v51 }
 0x155   :  { %v601_v54 = vsub.f32 %v183_v17, %v253_v52  ;;  %v603_v55 = vsub.f32 %v153_v16, %v247_v53 }
 0x156   :  { %v220_v56 = vpop.xlane.xlu1 %219  ;;  %v211_v57 = vpop.xlane.xlu0 %210 }
 0x157   :  { %v249_v58 = vmul.f32 0.015625, %v220_v56  ;;  %v246_v59 = vmul.f32 0.015625, %v211_v57  ;;  %v271_v60 = vmul.f32 %v603_v55, %v603_v55  ;;  %v277_v0 = vmul.f32 %v601_v54, %v601_v54 }
 0x159   :  { %v607_v61 = vsub.f32 %v163_v25, %v249_v58  ;;  %v609_v62 = vsub.f32 %v148_v20, %v246_v59  ;;  %v285_v63 = vsel %vm208_vm2, %v271_v60, 0.0  ;;  %v303_v9 = vsel %vm208_vm2, %v277_v0, 0.0 }
 0x15a   :  { %v238_v1 = vpop.xlane.xlu1 %237  ;;  %286 = vadd.xlane.f32.xlu1 %v285_v63  ;;  %v229_v2 = vpop.xlane.xlu0 %228 }
 0x15b   :  { %v255_v3 = vmul.f32 0.015625, %v238_v1  ;;  %v252_v4 = vmul.f32 0.015625, %v229_v2  ;;  %v270_v5 = vmul.f32 %v609_v62, %v609_v62  ;;  %v273_v6 = vmul.f32 %v607_v61, %v607_v61 }
 0x15d   :  { %v618_v7 = vsub.f32 %v193_v26, %v255_v3  ;;  %v620_v8 = vsub.f32 %v178_v28, %v252_v4  ;;  %v282_v10 = vsel %vm208_vm2, %v270_v5, 0.0  ;;  %v291_v16 = vsel %vm208_vm2, %v273_v6, 0.0 }
 0x15e   :  { %304 = vadd.xlane.f32.xlu1 %v303_v9  ;;  %v217_v11 = vpop.xlane.xlu1 %216  ;;  %283 = vadd.xlane.f32.xlu0 %v282_v10  ;;  %v235_v12 = vpop.xlane.xlu0 %234 }
 0x15f   :  { %v248_v13 = vmul.f32 0.015625, %v217_v11  ;;  %v254_v14 = vmul.f32 0.015625, %v235_v12  ;;  %v276_v15 = vmul.f32 %v620_v8, %v620_v8  ;;  %v279_v20 = vmul.f32 %v618_v7, %v618_v7 }
 0x161   :  { %v627_v17 = vsub.f32 %v158_v36, %v248_v13  ;;  %v629_v18 = vsub.f32 %v188_v37, %v254_v14  ;;  %v300_v19 = vsel %vm208_vm2, %v276_v15, 0.0  ;;  %v309_v29 = vsel %vm208_vm2, %v279_v20, 0.0  ;;  %v668_v14 = vld [vmem:[%s762_s3] ss:$0 sm:$0xff] }
 0x162   :  { %292 = vadd.xlane.f32.xlu1 %v291_v16  ;;  %v226_v21 = vpop.xlane.xlu1 %225  ;;  %301 = vadd.xlane.f32.xlu0 %v300_v19  ;;  %v223_v22 = vpop.xlane.xlu0 %222  ;;  %v674_v20 = vld [vmem:[%s763_s4] ss:$0 sm:$0xff] }
 0x163   :  { %v251_v23 = vmul.f32 0.015625, %v226_v21  ;;  %v250_v24 = vmul.f32 0.015625, %v223_v22  ;;  %v272_v25 = vmul.f32 %v627_v17, %v627_v17  ;;  %v278_v26 = vmul.f32 %v629_v18, %v629_v18 }
 0x165   :  { %v639_v27 = vsub.f32 %v583_v39, %v251_v23  ;;  %v642_v28 = vsub.f32 %v585_v40, %v250_v24  ;;  %v288_v30 = vsel %vm208_vm2, %v272_v25, 0.0  ;;  %v306_v36 = vsel %vm208_vm2, %v278_v26, 0.0 }
 0x166   :  { %310 = vadd.xlane.f32.xlu1 %v309_v29  ;;  %v244_v31 = vpop.xlane.xlu1 %243  ;;  %289 = vadd.xlane.f32.xlu0 %v288_v30  ;;  %v241_v32 = vpop.xlane.xlu0 %240 }
 0x167   :  { %v257_v33 = vmul.f32 0.015625, %v244_v31  ;;  %v256_v34 = vmul.f32 0.015625, %v241_v32  ;;  %v275_v35 = vmul.f32 %v639_v27, %v639_v27  ;;  %v274_v40 = vmul.f32 %v642_v28, %v642_v28 }
 0x169   :  { %v650_v37 = vsub.f32 %v589_v44, %v257_v33  ;;  %v653_v38 = vsub.f32 %v591_v45, %v256_v34  ;;  %v297_v39 = vsel %vm208_vm2, %v275_v35, 0.0  ;;  %v294_v43 = vsel %vm208_vm2, %v274_v40, 0.0 }
 0x16a   :  { %298 = vadd.xlane.f32.xlu1 %v297_v39  ;;  %307 = vadd.xlane.f32.xlu0 %v306_v36 }
 0x16b   :  { %v281_v41 = vmul.f32 %v650_v37, %v650_v37  ;;  %v280_v44 = vmul.f32 %v653_v38, %v653_v38 }
 0x16d   :  { %v315_v42 = vsel %vm208_vm2, %v281_v41, 0.0  ;;  %v312_v45 = vsel %vm208_vm2, %v280_v44, 0.0 }
 0x16e   :  { %316 = vadd.xlane.f32.xlu1 %v315_v42  ;;  %295 = vadd.xlane.f32.xlu0 %v294_v43 }
 0x172   :  { %313 = vadd.xlane.f32.xlu0 %v312_v45 }
 0x1e3   :  { %v287_v46 = vpop.xlane.xlu1 %286 }
 0x1e4   :  { %v319_v47 = vmul.f32 0.015625, %v287_v46 }
 0x1e6   :  { %v331_v48 = vadd.f32 1e-05, %v319_v47 }
 0x1e7   :  { %v305_v49 = vpop.xlane.xlu1 %304  ;;  %v284_v50 = vpop.xlane.xlu0 %283 }
 0x1e8   :  { %469 = vrsqrt.f32 %v331_v48  ;;  %v325_v51 = vmul.f32 0.015625, %v305_v49  ;;  %v318_v52 = vmul.f32 0.015625, %v284_v50 }
 0x1ea   :  { %v337_v53 = vadd.f32 1e-05, %v325_v51  ;;  %v330_v56 = vadd.f32 1e-05, %v318_v52 }
 0x1eb   :  { %v293_v57 = vpop.xlane.xlu1 %292  ;;  %v302_v58 = vpop.xlane.xlu0 %301 }
 0x1ec   :  { %471 = vrsqrt.f32 %v337_v53  ;;  %v321_v59 = vmul.f32 0.015625, %v293_v57  ;;  %v324_v60 = vmul.f32 0.015625, %v302_v58 }
 0x1ed   :  { %473 = vrsqrt.f32 %v330_v56 }
 0x1ee   :  { %v333_v63 = vadd.f32 1e-05, %v321_v59  ;;  %v336_v0 = vadd.f32 1e-05, %v324_v60 }
 0x1ef   :  { %v311_v1 = vpop.xlane.xlu1 %310  ;;  %v290_v2 = vpop.xlane.xlu0 %289 }
 0x1f0   :  { %475 = vrsqrt.f32 %v333_v63  ;;  %v327_v3 = vmul.f32 0.015625, %v311_v1  ;;  %v320_v4 = vmul.f32 0.015625, %v290_v2 }
 0x1f1   :  { %477 = vrsqrt.f32 %v336_v0 }
 0x1f2   :  { %v339_v5 = vadd.f32 1e-05, %v327_v3  ;;  %v332_v6 = vadd.f32 1e-05, %v320_v4 }
 0x1f3   :  { %v299_v9 = vpop.xlane.xlu1 %298  ;;  %v308_v10 = vpop.xlane.xlu0 %307 }
 0x1f4   :  { %479 = vrsqrt.f32 %v339_v5  ;;  %v323_v11 = vmul.f32 0.015625, %v299_v9  ;;  %v326_v12 = vmul.f32 0.015625, %v308_v10 }
 0x1f5   :  { %v470_v13 = vpop.eup %469  ;;  %481 = vrsqrt.f32 %v332_v6 }
 0x1f6   :  { %v355_v15 = vmul.f32 %v470_v13, %v603_v55  ;;  %v335_v16 = vadd.f32 1e-05, %v323_v11  ;;  %v338_v19 = vadd.f32 1e-05, %v326_v12 }
 0x1f7   :  { %v317_v21 = vpop.xlane.xlu1 %316  ;;  %v296_v22 = vpop.xlane.xlu0 %295 }
 0x1f8   :  { %v373_v23 = vmul.f32 %v668_v14, %v355_v15  ;;  %483 = vrsqrt.f32 %v335_v16  ;;  %v329_v24 = vmul.f32 0.015625, %v317_v21  ;;  %v322_v25 = vmul.f32 0.015625, %v296_v22 }
 0x1f9   :  { %v472_v26 = vpop.eup %471  ;;  %485 = vrsqrt.f32 %v338_v19 }
 0x1fa   :  { %v474_v29 = vpop.eup %473  ;;  %v391_v30 = vadd.f32 %v674_v20, %v373_v23  ;;  %v361_v55 = vmul.f32 %v472_v26, %v601_v54  ;;  %v341_v31 = vadd.f32 1e-05, %v329_v24  ;;  %v334_v32 = vadd.f32 1e-05, %v322_v25 }
 0x1fb   :  { %v354_v33 = vmul.f32 %v474_v29, %v609_v62  ;;  %v314_v34 = vpop.xlane.xlu0 %313 }
 0x1fc   :  { %403 = vst.msk [vmem:[%s764_s5 + $0x8] sm:$0xff] %vm208_vm2, %v391_v30  ;;  %v379_v35 = vmul.f32 %v668_v14, %v361_v55  ;;  %487 = vrsqrt.f32 %v341_v31  ;;  %v328_v36 = vmul.f32 0.015625, %v314_v34 }
 0x1fd   :  { %v476_v39 = vpop.eup %475  ;;  %v372_v40 = vmul.f32 %v668_v14, %v354_v33  ;;  %489 = vrsqrt.f32 %v334_v32 }
 0x1fe   :  { %v478_v41 = vpop.eup %477  ;;  %v397_v54 = vadd.f32 %v674_v20, %v379_v35  ;;  %v357_v42 = vmul.f32 %v476_v39, %v607_v61  ;;  %v340_v62 = vadd.f32 1e-05, %v328_v36 }
 0x1ff   :  { %v390_v43 = vadd.f32 %v674_v20, %v372_v40  ;;  %v360_v44 = vmul.f32 %v478_v41, %v620_v8 }
 0x200   :  { %409 = vst.msk [vmem:[%s764_s5 + $0x38] sm:$0xff] %vm208_vm2, %v397_v54  ;;  %v375_v45 = vmul.f32 %v668_v14, %v357_v42  ;;  %491 = vrsqrt.f32 %v340_v62 }
 0x201   :  { %v480_v46 = vpop.eup %479  ;;  %402 = vst.msk [vmem:[%s764_s5] sm:$0xff] %vm208_vm2, %v390_v43  ;;  %v378_v61 = vmul.f32 %v668_v14, %v360_v44 }
 0x202   :  { %v482_v47 = vpop.eup %481  ;;  %v393_v48 = vadd.f32 %v674_v20, %v375_v45  ;;  %v363_v8 = vmul.f32 %v480_v46, %v618_v7 }
 0x203   :  { %v396_v49 = vadd.f32 %v674_v20, %v378_v61  ;;  %v356_v50 = vmul.f32 %v482_v47, %v627_v17 }
 0x204   :  { %405 = vst.msk [vmem:[%s764_s5 + $0x18] sm:$0xff] %vm208_vm2, %v393_v48  ;;  %v381_v51 = vmul.f32 %v668_v14, %v363_v8 }
 0x205   :  { %v484_v52 = vpop.eup %483  ;;  %408 = vst.msk [vmem:[%s764_s5 + $0x30] sm:$0xff] %vm208_vm2, %v396_v49  ;;  %v374_v53 = vmul.f32 %v668_v14, %v356_v50 }
 0x206   :  { %v486_v7 = vpop.eup %485  ;;  %v399_v56 = vadd.f32 %v674_v20, %v381_v51  ;;  %v359_v17 = vmul.f32 %v484_v52, %v639_v27 }
 0x207   :  { %v392_v57 = vadd.f32 %v674_v20, %v374_v53  ;;  %v362_v58 = vmul.f32 %v486_v7, %v629_v18 }
 0x208   :  { %411 = vst.msk [vmem:[%s764_s5 + $0x48] sm:$0xff] %vm208_vm2, %v399_v56  ;;  %v377_v59 = vmul.f32 %v668_v14, %v359_v17 }
 0x209   :  { %v488_v60 = vpop.eup %487  ;;  %404 = vst.msk [vmem:[%s764_s5 + $0x10] sm:$0xff] %vm208_vm2, %v392_v57  ;;  %v380_v63 = vmul.f32 %v668_v14, %v362_v58 }
 0x20a   :  { %v490_v27 = vpop.eup %489  ;;  %v395_v0 = vadd.f32 %v674_v20, %v377_v59  ;;  %v365_v18 = vmul.f32 %v488_v60, %v650_v37 }
 0x20b   :  { %v398_v1 = vadd.f32 %v674_v20, %v380_v63  ;;  %v358_v2 = vmul.f32 %v490_v27, %v642_v28 }
 0x20c   :  { %407 = vst.msk [vmem:[%s764_s5 + $0x28] sm:$0xff] %vm208_vm2, %v395_v0  ;;  %v383_v3 = vmul.f32 %v668_v14, %v365_v18 }
 0x20d   :  { %v492_v4 = vpop.eup %491  ;;  %410 = vst.msk [vmem:[%s764_s5 + $0x40] sm:$0xff] %vm208_vm2, %v398_v1  ;;  %v376_v5 = vmul.f32 %v668_v14, %v358_v2 }
 0x20e   :  { %v401_v37 = vadd.f32 %v674_v20, %v383_v3  ;;  %v364_v6 = vmul.f32 %v492_v4, %v653_v38 }
 0x20f   :  { %v394_v28 = vadd.f32 %v674_v20, %v376_v5 }
 0x210   :  { %413 = vst.msk [vmem:[%s764_s5 + $0x58] sm:$0xff] %vm208_vm2, %v401_v37  ;;  %v382_v9 = vmul.f32 %v668_v14, %v364_v6 }
 0x211   :  { %406 = vst.msk [vmem:[%s764_s5 + $0x20] sm:$0xff] %vm208_vm2, %v394_v28 }
 0x212   :  { %v400_v10 = vadd.f32 %v674_v20, %v382_v9 }
 0x214   :  { %412 = vst.msk [vmem:[%s764_s5 + $0x50] sm:$0xff] %vm208_vm2, %v400_v10 }

// kernel: second_view_pre_layer.3
= control target key start
LH: loop header
LB: loop body
LE: loop exit
PB: predicated region body
PF: predicated region fallthrough
CT: control target
= control target key end

     0   :  { %v2496_v2 = vmov 0   ;;  %s3504_s0 = inlined_call_operand.vmem [shape: f32[64,1], index: 0, kind: input, shape index: {}]   ;;  %s3505_s1 = inlined_call_operand.vmem [shape: bf16[64,64], index: 1, kind: input, shape index: {}]   ;;  %s3506_s2 = inlined_call_operand.vmem [shape: f32[1,32], index: 2, kind: input, shape index: {}]   ;;  %s3507_s3 = inlined_call_operand.vmem [shape: f32[32,64], index: 3, kind: input, shape index: {}]   ;;  %s3508_s4 = inlined_call_operand.vmem [shape: f32[32,64], index: 4, kind: input, shape index: {}]   ;;  %s3509_s5 = inlined_call_operand.vmem [shape: f32[1,64], index: 5, kind: input, shape index: {}]   ;;  %s3510_s6 = inlined_call_operand.vmem [shape: f32[1,64], index: 6, kind: input, shape index: {}]   ;;  %s3511_s7 = inlined_call_operand.vmem [shape: f32[1,64], index: 7, kind: input, shape index: {}]   ;;  %s3512_s8 = inlined_call_operand.hbm [shape: f32[64,64], index: 8, kind: output, shape index: {}]  }
   0x1   :  { %v32_v0 = vld [vmem:[%s3504_s0 + $0x10] sm:$0xff]  ;;  %v30_v1 = vld [vmem:[%s3504_s0] sm:$0xff]  ;;  %2425 = vset.pattern.permute.xlu1 %v2496_v2  ;;  %2424 = vset.pattern.permute.xlu0 %v2496_v2  ;;  %v33_v3 = vld [vmem:[%s3504_s0 + $0x18] sm:$0xff] }
   0x2   :  { %51 = vperm.xlu1 %2425, %v32_v0   ;;  %41 = vperm.xlu0 %2424, %v30_v1   ;;  %v31_v4 = vld [vmem:[%s3504_s0 + $0x8] sm:$0xff] }
   0x3   :  { %13 = vsyncpa [#allocation3], 0  ;;  %v35_v5 = vld [vmem:[%s3504_s0 + $0x28] sm:$0xff]  ;;  %v34_v6 = vld [vmem:[%s3504_s0 + $0x20] sm:$0xff]  ;;  %v2497_v33 = vmov 683565275  }
   0x4   :  { %v37_v7 = vld [vmem:[%s3504_s0 + $0x38] sm:$0xff]  ;;  %v36_v8 = vld [vmem:[%s3504_s0 + $0x30] sm:$0xff]  ;;  %v2578_v9 = vld [vmem:[%s3506_s2] ss:$0 sm:$0xff]  ;;  %v3523_v35 = vmov 2475754826  }
   0x5   :  { %v3519_v37 = vmov 2131351028   ;;  %v3521_v39 = vmov 2102212464   ;;  %v2501_v41 = vmov 920167782  }
   0x6   :  { %56 = vperm.xlu1 %2425, %v33_v3   ;;  %46 = vperm.xlu0 %2424, %v31_v4   ;;  %v2502_v50 = vmov 1326507024  }
   0xa   :  { %66 = vperm.xlu1 %2425, %v35_v5   ;;  %61 = vperm.xlu0 %2424, %v34_v6  }
   0xe   :  { %76 = vperm.xlu1 %2425, %v37_v7   ;;  %71 = vperm.xlu0 %2424, %v36_v8  }
  0x7d   :  { %v52_v10 = vpop.permute.xlu1 %51  ;;  %v42_v13 = vpop.permute.xlu0 %41 }
  0x7e   :  { %v2581_v11 = vmul.f32 %v2578_v9, %v52_v10  ;;  %v2592_v23 = vmul.f32 %v2578_v9, %v42_v13 }
  0x80   :  { %v304_v12 = vand.u32 2139095040, %v2581_v11  ;;  %v3516_v14 = vand.u32 2147483647, %v2581_v11  ;;  %v96_v30 = vand.u32 2139095040, %v2592_v23 }
  0x81   :  { %v57_v15 = vpop.permute.xlu1 %56  ;;  %v47_v22 = vpop.permute.xlu0 %46 }
  0x82   :  { %v305_v16 = vshrl.u32 %v304_v12, 23  ;;  %v2586_v17 = vmul.f32 %v2578_v9, %v57_v15  ;;  %v308_v19 = vand.u32 8388607, %v3516_v14  ;;  %v2595_v26 = vmul.f32 %v2578_v9, %v47_v22 }
  0x83   :  { %v97_v8 = vshrl.u32 %v96_v30, 23 }
  0x84   :  { %v2224_v18 = vadd.s32 4294967169, %v305_v16  ;;  %v408_v21 = vand.u32 2139095040, %v2586_v17  ;;  %v309_v24 = vor.u32 8388608, %v308_v19  ;;  %v3515_v31 = vand.u32 2147483647, %v2586_v17 }
  0x85   :  { %v200_v44 = vand.u32 2139095040, %v2595_v26 }
  0x86   :  { %v311_v20 = vadd.s32 1, %v2224_v18  ;;  %v409_v28 = vshrl.u32 %v408_v21, 23  ;;  %v349_v43 = vshll.u32 %v309_v24, 8  ;;  %v412_v58 = vand.u32 8388607, %v3515_v31 }
  0x87   :  { %v201_v1 = vshrl.u32 %v200_v44, 23  ;;  %v2216_v21 = vadd.s32 4294967169, %v97_v8 }
  0x88   :  { %vm312_vm0 = vcmp.gt.s32.totalorder %v311_v20, 0  ;;  %v2228_v48 = vadd.s32 4294967169, %v409_v28  ;;  %v413_v10 = vor.u32 8388608, %v412_v58 }
  0x89   :  { %v313_v25 = vsel %vm312_vm0, %v311_v20, 0  ;;  %v2220_v19 = vadd.s32 4294967169, %v201_v1 }
  0x8a   :  { %v315_v27 = vand.u32 31, %v313_v25  ;;  %v314_v29 = vshrl.u32 %v313_v25, 5  ;;  %v415_v62 = vadd.s32 1, %v2228_v48  ;;  %v2623_v25 = vshll.u32 %v413_v10, 8 }
  0x8c   :  { %v316_v32 = vsub.s32 32, %v315_v27  ;;  %v318_v34 = vshll.u32 %v2497_v33, %v315_v27  ;;  %v321_v36 = vshll.u32 %v3523_v35, %v315_v27  ;;  %v324_v38 = vshll.u32 %v3519_v37, %v315_v27 }
  0x8d   :  { %v327_v40 = vshll.u32 %v3521_v39, %v315_v27  ;;  %v330_v42 = vshll.u32 %v2501_v41, %v315_v27  ;;  %vm333_vm1 = vcmp.lt.s32.totalorder %v314_v29, 1  ;;  %vm336_vm2 = vcmp.lt.s32.totalorder %v314_v29, 4 }
  0x8e   :  { %v319_v45 = vshrl.u32 %v3523_v35, %v316_v32  ;;  %v322_v46 = vshrl.u32 %v3519_v37, %v316_v32  ;;  %v325_v47 = vshrl.u32 %v3521_v39, %v316_v32  ;;  %v328_v49 = vshrl.u32 %v2501_v41, %v316_v32 }
  0x8f   :  { %v331_v51 = vshrl.u32 %v2502_v50, %v316_v32  ;;  %v317_v52 = vshrl.u32 %v2497_v33, %v316_v32  ;;  %vm335_vm3 = vcmp.lt.s32.totalorder %v314_v29, 3  ;;  %vm334_vm4 = vcmp.lt.s32.totalorder %v314_v29, 2 }
  0x90   :  { %v320_v53 = vor.u32 %v319_v45, %v318_v34  ;;  %v323_v54 = vor.u32 %v322_v46, %v321_v36  ;;  %v326_v55 = vor.u32 %v325_v47, %v324_v38  ;;  %v329_v56 = vor.u32 %v328_v49, %v327_v40 }
  0x91   :  { %v332_v57 = vor.u32 %v331_v51, %v330_v42  ;;  %vm416_vm5 = vcmp.gt.s32.totalorder %v415_v62, 0  ;;  %v207_v29 = vadd.s32 1, %v2220_v19 }
  0x92   :  { %v338_v59 = vsel %vm336_vm2, %v326_v55, 2102212464  ;;  %v341_v60 = vsel %vm333_vm1, %v320_v53, %v323_v54  ;;  %v345_v61 = vsel %vm333_vm1, %v323_v54, %v326_v55  ;;  %v342_v63 = vsel %vm336_vm2, %v329_v56, 920167782 }
  0x93   :  { %v346_v0 = vsel %vm336_vm2, %v332_v57, 1326507024  ;;  %v337_v2 = vsel %vm333_vm1, %v317_v52, %v320_v53  ;;  %v339_v3 = vsel %vm335_vm3, %v323_v54, %v338_v59  ;;  %v343_v4 = vsel %vm335_vm3, %v326_v55, %v342_v63 }
  0x94   :  { %v347_v5 = vsel %vm335_vm3, %v329_v56, %v346_v0  ;;  %v344_v6 = vsel %vm334_vm4, %v341_v60, %v343_v4  ;;  %v340_v18 = vsel %vm334_vm4, %v337_v2, %v339_v3  ;;  %v417_v20 = vsel %vm416_vm5, %v415_v62, 0 }
  0x95   :  { %v348_v7 = vsel %vm334_vm4, %v345_v61, %v347_v5  ;;  %v2619_v15 = vmul.u32.u64.low %v349_v43, %v344_v6  ;;  %v2620_v16 = vmul.u32.u64.high %v349_v43, %v344_v6, %v2619_v15  ;;  %v418_v22 = vshrl.u32 %v417_v20, 5 }
  0x96   :  { %v2616_v12 = vmul.u32.u64.low %v349_v43, %v348_v7  ;;  %v2617_v13 = vmul.u32.u64.high %v349_v43, %v348_v7, %v2616_v12  ;;  %v419_v24 = vand.u32 31, %v417_v20  ;;  %v356_v27 = vmul.u32 %v349_v43, %v340_v18 }
  0x97   :  { %v359_v28 = vadd.s32 1, %v2620_v16  ;;  %vm437_vm7 = vcmp.lt.s32.totalorder %v418_v22, 1  ;;  %vm438_vm8 = vcmp.lt.s32.totalorder %v418_v22, 2  ;;  %vm439_vm9 = vcmp.lt.s32.totalorder %v418_v22, 3 }
  0x98   :  { %vm358_vm6 = vc.u32 %v2617_v13, %v2619_v15  ;;  %v420_v30 = vsub.s32 32, %v419_v24  ;;  %v422_v32 = vshll.u32 %v2497_v33, %v419_v24  ;;  %v425_v34 = vshll.u32 %v3523_v35, %v419_v24 }
  0x99   :  { %v428_v36 = vshll.u32 %v3519_v37, %v419_v24  ;;  %v360_v38 = vsel %vm358_vm6, %v359_v28, %v2620_v16  ;;  %v431_v40 = vshll.u32 %v3521_v39, %v419_v24  ;;  %v434_v42 = vshll.u32 %v2501_v41, %v419_v24  ;;  %v67_v16 = vpop.permute.xlu1 %66 }
  0x9a   :  { %v361_v43 = vadd.s32 %v360_v38, %v356_v27  ;;  %v421_v44 = vshrl.u32 %v2497_v33, %v420_v30  ;;  %v423_v45 = vshrl.u32 %v3523_v35, %v420_v30  ;;  %v426_v46 = vshrl.u32 %v3519_v37, %v420_v30 }
  0x9b   :  { %v429_v47 = vshrl.u32 %v3521_v39, %v420_v30  ;;  %v432_v48 = vshrl.u32 %v2501_v41, %v420_v30  ;;  %v435_v49 = vshrl.u32 %v2502_v50, %v420_v30  ;;  %vm440_vm10 = vcmp.lt.s32.totalorder %v418_v22, 4 }
  0x9c   :  { %v362_v51 = vadd.s32 536870912, %v361_v43  ;;  %v424_v52 = vor.u32 %v423_v45, %v422_v32  ;;  %v427_v53 = vor.u32 %v426_v46, %v425_v34  ;;  %vm208_vm11 = vcmp.gt.s32.totalorder %v207_v29, 0 }
  0x9d   :  { %v430_v54 = vor.u32 %v429_v47, %v428_v36  ;;  %v433_v55 = vor.u32 %v432_v48, %v431_v40  ;;  %v436_v56 = vor.u32 %v435_v49, %v434_v42  ;;  %v3517_v6 = vand.u32 2147483647, %v2595_v26 }
  0x9e   :  { %v2640_v57 = vshrl.u32 %v362_v51, 30  ;;  %v441_v58 = vsel %vm437_vm7, %v421_v44, %v424_v52  ;;  %v445_v59 = vsel %vm437_vm7, %v424_v52, %v427_v53  ;;  %v209_v7 = vsel %vm208_vm11, %v207_v29, 0 }
  0x9f   :  { %v442_v60 = vsel %vm440_vm10, %v430_v54, 2102212464  ;;  %v446_v61 = vsel %vm440_vm10, %v433_v55, 920167782  ;;  %v449_v62 = vsel %vm437_vm7, %v427_v53, %v430_v54  ;;  %v450_v63 = vsel %vm440_vm10, %v436_v56, 1326507024 }
  0xa0   :  { %v364_v0 = vshll.u32 %v2640_v57, 30  ;;  %v443_v1 = vsel %vm439_vm9, %v427_v53, %v442_v60  ;;  %v447_v2 = vsel %vm439_vm9, %v430_v54, %v446_v61  ;;  %v451_v3 = vsel %vm439_vm9, %v433_v55, %v450_v63 }
  0xa1   :  { %v448_v4 = vsel %vm438_vm8, %v445_v59, %v447_v2  ;;  %v452_v5 = vsel %vm438_vm8, %v449_v62, %v451_v3  ;;  %v444_v18 = vsel %vm438_vm8, %v441_v58, %v443_v1  ;;  %v211_v24 = vand.u32 31, %v209_v7 }
  0xa2   :  { %v2652_v8 = vsub.s32 %v361_v43, %v364_v0  ;;  %v2655_v10 = vmul.u32.u64.low %v2623_v25, %v452_v5  ;;  %v2656_v12 = vmul.u32.u64.high %v2623_v25, %v452_v5, %v2655_v10  ;;  %v103_v27 = vadd.s32 1, %v2216_v21 }
  0xa3   :  { %v2660_v19 = vmul.u32.u64.low %v2623_v25, %v448_v4  ;;  %v2661_v20 = vmul.u32.u64.high %v2623_v25, %v448_v4, %v2660_v19  ;;  %v204_v28 = vand.u32 8388607, %v3517_v6  ;;  %v212_v29 = vsub.s32 32, %v211_v24 }
  0xa4   :  { %v2667_v30 = vmul.f32 %v2578_v9, %v67_v16  ;;  %v367_v32 = vsub.s32 0, %v2652_v8  ;;  %v460_v34 = vmul.u32 %v2623_v25, %v444_v18  ;;  %v210_v22 = vshrl.u32 %v209_v7, 5 }
  0xa5   :  { %vm462_vm12 = vc.u32 %v2656_v12, %v2660_v19  ;;  %v463_v36 = vadd.s32 1, %v2661_v20  ;;  %v214_v38 = vshll.u32 %v2497_v33, %v211_v24  ;;  %v215_v21 = vshrl.u32 %v3523_v35, %v212_v29 }
  0xa6   :  { %v218_v40 = vshrl.u32 %v3519_v37, %v212_v29  ;;  %v217_v42 = vshll.u32 %v3523_v35, %v211_v24  ;;  %v221_v43 = vshrl.u32 %v3521_v39, %v212_v29  ;;  %v223_v44 = vshll.u32 %v3521_v39, %v211_v24 }
  0xa7   :  { %v224_v25 = vshrl.u32 %v2501_v41, %v212_v29  ;;  %v464_v45 = vsel %vm462_vm12, %v463_v36, %v2661_v20  ;;  %v220_v46 = vshll.u32 %v3519_v37, %v211_v24  ;;  %v226_v47 = vshll.u32 %v2501_v41, %v211_v24 }
  0xa8   :  { %v227_v48 = vshrl.u32 %v2502_v50, %v212_v29  ;;  %v465_v49 = vadd.s32 %v464_v45, %v460_v34  ;;  %v216_v51 = vor.u32 %v215_v21, %v214_v38  ;;  %v219_v52 = vor.u32 %v218_v40, %v217_v42  ;;  %v1755_v45 = vld [vmem:[%s3508_s4 + $0x10] sm:$0xff] }
  0xa9   :  { %v225_v53 = vor.u32 %v224_v25, %v223_v44  ;;  %vm104_vm13 = vcmp.gt.s32.totalorder %v103_v27, 0  ;;  %v222_v54 = vor.u32 %v221_v43, %v220_v46  ;;  %v2225_v56 = vmin.u32 %v367_v32, %v2652_v8  ;;  %v1756_v25 = vld [vmem:[%s3508_s4 + $0x18] sm:$0xff] }
  0xaa   :  { %v228_v55 = vor.u32 %v227_v48, %v226_v47  ;;  %v466_v58 = vadd.s32 536870912, %v465_v49  ;;  %vm232_vm14 = vcmp.lt.s32.totalorder %v210_v22, 4  ;;  %v205_v59 = vor.u32 8388608, %v204_v28  ;;  %2342 = vmatprep.subr.mxu0 %v1756_v25  ;;  %v927_v48 = vld [vmem:[%s3507_s3 + $0x10] sm:$0xff] }
  0xab   :  { %vm229_vm15 = vcmp.lt.s32.totalorder %v210_v22, 1  ;;  %v238_v60 = vsel %vm232_vm14, %v225_v53, 920167782  ;;  %v616_v61 = vand.u32 2139095040, %v2667_v30  ;;  %v105_v62 = vsel %vm104_vm13, %v103_v27, 0  ;;  %2343 = vmatpush3.msra.mxu0 %v1756_v25 }
  0xac   :  { %v2687_v63 = vshrl.u32 %v466_v58, 30  ;;  %vm231_vm0 = vcmp.lt.s32.totalorder %v210_v22, 3  ;;  %v237_v0 = vsel %vm229_vm15, %v216_v51, %v219_v52  ;;  %v234_v1 = vsel %vm232_vm14, %v222_v54, 2102212464  ;;  %2344 = vmatprep.subr.mxu0 %v1755_v45 }
  0xad   :  { %v239_v2 = vsel %vm231_vm0, %v222_v54, %v238_v60  ;;  %v241_v3 = vsel %vm229_vm15, %v219_v52, %v222_v54  ;;  %v242_v4 = vsel %vm232_vm14, %v228_v55, 1326507024  ;;  %v369_v5 = vclz %v2225_v56  ;;  %2345 = vmatpush3.msra.mxu0 %v1755_v45 }
  0xae   :  { %3535 = vst [vmem:[#allocation5_spill] sm:$0xff] %v2687_v63  ;;  %v468_v7 = vshll.u32 %v2687_v63, 30  ;;  %v213_v10 = vshrl.u32 %v2497_v33, %v212_v29  ;;  %vm230_vm1 = vcmp.lt.s32.totalorder %v210_v22, 2  ;;  %v243_v18 = vsel %vm231_vm0, %v225_v53, %v242_v4  ;;  %v928_v22 = vld [vmem:[%s3507_s3 + $0x18] sm:$0xff]  ;;  %v62_v4 = vpop.permute.xlu0 %61 }
  0xaf   :  { %v240_v16 = vsel %vm230_vm1, %v237_v0, %v239_v2  ;;  %v245_v20 = vshll.u32 %v205_v59, 8  ;;  %v617_v24 = vshrl.u32 %v616_v61, 23  ;;  %v2695_v27 = vand.u32 31, %v105_v62  ;;  %2362 = vmatprep.subr.mxu1 %v928_v22 }
  0xb0   :  { %v233_v28 = vsel %vm229_vm15, %v213_v10, %v216_v51  ;;  %v235_v32 = vsel %vm231_vm0, %v219_v52, %v234_v1  ;;  %v244_v34 = vsel %vm230_vm1, %v241_v3, %v243_v18  ;;  %v2226_v29 = vadd.s32 4294967294, %v369_v5  ;;  %2363 = vmatpush3.msra.mxu1 %v928_v22  ;;  %v1754_v51 = vld [vmem:[%s3508_s4 + $0x8] sm:$0xff] }
  0xb1   :  { %v2699_v36 = vmul.u32.u64.low %v245_v20, %v244_v34  ;;  %v2700_v38 = vmul.u32.u64.high %v245_v20, %v244_v34, %v2699_v36  ;;  %v2702_v21 = vmul.u32.u64.low %v245_v20, %v240_v16  ;;  %v2703_v40 = vmul.u32.u64.high %v245_v20, %v240_v16, %v2702_v21  ;;  %2364 = vmatprep.subr.mxu1 %v927_v48  ;;  %2346 = vmatprep.subr.mxu0 %v1754_v51 }
  0xb2   :  { %v2706_v42 = vsub.s32 %v465_v49, %v468_v7  ;;  %v2236_v43 = vadd.s32 4294967169, %v617_v24  ;;  %v236_v44 = vsel %vm230_vm1, %v233_v28, %v235_v32  ;;  %v2718_v46 = vsub.s32 32, %v2695_v27  ;;  %2365 = vmatpush3.msra.mxu1 %v927_v48  ;;  %2347 = vmatpush3.msra.mxu0 %v1754_v51 }
  0xb3   :  { %vm254_vm2 = vc.u32 %v2700_v38, %v2702_v21  ;;  %v255_v49 = vadd.s32 1, %v2703_v40  ;;  %vm2227_vm3 = vcmp.lt.s32.totalorder %v2226_v29, 0  ;;  %v252_v53 = vmul.u32 %v245_v20, %v236_v44 }
  0xb4   :  { %v623_v47 = vadd.s32 1, %v2236_v43  ;;  %v471_v52 = vsub.s32 0, %v2706_v42  ;;  %v3513_v56 = vand.u32 2147483647, %v2592_v23  ;;  %v120_v58 = vshrl.u32 %v2501_v41, %v2718_v46 }
  0xb5   :  { %v256_v54 = vsel %vm254_vm2, %v255_v49, %v2703_v40  ;;  %v3514_v60 = vand.u32 2147483647, %v2667_v30  ;;  %v2735_v61 = vsel %vm2227_vm3, 0, %v2226_v29  ;;  %v119_v1 = vshll.u32 %v3521_v39, %v2695_v27 }
  0xb6   :  { %vm624_vm4 = vcmp.gt.s32.totalorder %v623_v47, 0  ;;  %v257_v59 = vadd.s32 %v256_v54, %v252_v53  ;;  %v2229_v2 = vmin.u32 %v471_v52, %v2706_v42  ;;  %v2740_v5 = vshrl.u32 %v105_v62, 5 }
  0xb7   :  { %v625_v55 = vsel %vm624_vm4, %v623_v47, 0  ;;  %v2744_v7 = vshll.u32 %v2501_v41, %v2695_v27  ;;  %v2748_v16 = vand.u32 8388607, %v3513_v56  ;;  %v377_v18 = vsub.s32 4294967266, %v2735_v61 }
  0xb8   :  { %v627_v0 = vand.u32 31, %v625_v55  ;;  %v258_v3 = vadd.s32 536870912, %v257_v59  ;;  %v2751_v20 = vor.u32 %v120_v58, %v119_v1  ;;  %v2755_v24 = vshrl.u32 %v2502_v50, %v2718_v46 }
  0xb9   :  { %v620_v62 = vand.u32 8388607, %v3514_v60  ;;  %v373_v28 = vsub.s32 32, %v2735_v61  ;;  %v2764_v36 = vmul.f32 %v2578_v9, %v62_v4  ;;  %v473_v40 = vclz %v2229_v2 }
  0xba   :  { %v628_v10 = vsub.s32 32, %v627_v0  ;;  %v2760_v32 = vshrl.u32 %v258_v3, 30  ;;  %v630_v29 = vshll.u32 %v2497_v33, %v627_v0  ;;  %v633_v43 = vshll.u32 %v3523_v35, %v627_v0 }
  0xbb   :  { %v626_v22 = vshrl.u32 %v625_v55, 5  ;;  %v636_v45 = vshll.u32 %v3519_v37, %v627_v0  ;;  %v2772_v48 = vadd.s32 127, %v377_v18  ;;  %v621_v49 = vor.u32 8388608, %v620_v62 }
  0xbc   :  { %v631_v34 = vshrl.u32 %v3523_v35, %v628_v10  ;;  %v634_v44 = vshrl.u32 %v3519_v37, %v628_v10  ;;  %v260_v25 = vshll.u32 %v2760_v32, 30  ;;  %v637_v47 = vshrl.u32 %v3521_v39, %v628_v10 }
  0xbd   :  { %v639_v58 = vshll.u32 %v3521_v39, %v627_v0  ;;  %v640_v1 = vshrl.u32 %v2501_v41, %v628_v10  ;;  %v2230_v2 = vadd.s32 4294967294, %v473_v40  ;;  %v642_v3 = vshll.u32 %v2501_v41, %v627_v0 }
  0xbe   :  { %v632_v51 = vor.u32 %v631_v34, %v630_v29  ;;  %v635_v52 = vor.u32 %v634_v44, %v633_v43  ;;  %v2774_v53 = vsub.s32 %v257_v59, %v260_v25  ;;  %v638_v54 = vor.u32 %v637_v47, %v636_v45 }
  0xbf   :  { %v643_v55 = vshrl.u32 %v2502_v50, %v628_v10  ;;  %v3518_v4 = vand.u32 2147483647, %v2764_v36  ;;  %v641_v56 = vor.u32 %v640_v1, %v639_v58  ;;  %vm645_vm5 = vcmp.lt.s32.totalorder %v626_v22, 1 }
  0xc0   :  { %v263_v18 = vsub.s32 0, %v2774_v53  ;;  %v512_v62 = vand.u32 2139095040, %v2764_v36  ;;  %v629_v59 = vshrl.u32 %v2497_v33, %v628_v10  ;;  %vm647_vm6 = vcmp.lt.s32.totalorder %v626_v22, 3 }
  0xc1   :  { %v644_v34 = vor.u32 %v643_v55, %v642_v3  ;;  %vm648_vm7 = vcmp.lt.s32.totalorder %v626_v22, 4  ;;  %v653_v43 = vsel %vm645_vm5, %v632_v51, %v635_v52  ;;  %vm646_vm8 = vcmp.lt.s32.totalorder %v626_v22, 2 }
  0xc2   :  { %v2221_v29 = vmin.u32 %v263_v18, %v2774_v53  ;;  %v650_v40 = vsel %vm648_vm7, %v638_v54, 2102212464  ;;  %v654_v0 = vsel %vm648_vm7, %v641_v56, 920167782  ;;  %v657_v25 = vsel %vm645_vm5, %v635_v52, %v638_v54 }
  0xc3   :  { %v655_v44 = vsel %vm647_vm6, %v638_v54, %v654_v0  ;;  %v661_v45 = vshll.u32 %v621_v49, 8  ;;  %v649_v60 = vsel %vm645_vm5, %v629_v59, %v632_v51  ;;  %v658_v1 = vsel %vm648_vm7, %v644_v34, 1326507024 }
  0xc4   :  { %v265_v47 = vclz %v2221_v29  ;;  %v656_v58 = vsel %vm646_vm8, %v653_v43, %v655_v44  ;;  %v651_v31 = vsel %vm647_vm6, %v635_v52, %v650_v40  ;;  %v659_v14 = vsel %vm647_vm6, %v641_v56, %v658_v1  ;;  %v77_v52 = vpop.permute.xlu1 %76  ;;  %v925_v1 = vld [vmem:[%s3507_s3] sm:$0xff] }
  0xc5   :  { %v2786_v10 = vmul.u32.u64.low %v661_v45, %v656_v58  ;;  %v2787_v3 = vmul.u32.u64.high %v661_v45, %v656_v58, %v2786_v10  ;;  %vm2231_vm9 = vcmp.lt.s32.totalorder %v2230_v2, 0  ;;  %v660_v18 = vsel %vm646_vm8, %v657_v25, %v659_v14  ;;  %v1753_v58 = vld [vmem:[%s3508_s4] sm:$0xff] }
  0xc6   :  { %v2222_v55 = vadd.s32 4294967294, %v265_v47  ;;  %v513_v6 = vshrl.u32 %v512_v62, 23  ;;  %v357_v54 = vadd.s32 %v2619_v15, %v2617_v13  ;;  %v124_v49 = vor.u32 %v2755_v24, %v2744_v7  ;;  %2348 = vmatprep.subr.mxu0 %v1753_v58 }
  0xc7   :  { %v2795_v51 = vmul.u32.u64.low %v661_v45, %v660_v18  ;;  %v2796_v59 = vmul.u32.u64.high %v661_v45, %v660_v18, %v2795_v51  ;;  %v652_v56 = vsel %vm646_vm8, %v649_v60, %v651_v31  ;;  %v516_v29 = vand.u32 8388607, %v3518_v4  ;;  %2349 = vmatpush3.msra.mxu0 %v1753_v58 }
  0xc8   :  { %vm2223_vm10 = vcmp.lt.s32.totalorder %v2222_v55, 0  ;;  %v2232_v34 = vadd.s32 4294967169, %v513_v6  ;;  %v379_v14 = vshll.u32 %v2772_v48, 23  ;;  %vm128_vm11 = vcmp.lt.s32.totalorder %v2740_v5, 4 }
  0xc9   :  { %v2803_v62 = vsel %vm2231_vm9, 0, %v2230_v2  ;;  %v671_v13 = vadd.s32 1, %v2787_v3  ;;  %v375_v15 = vshrl.u32 %v357_v54, %v373_v28  ;;  %v2811_v7 = vsel %vm128_vm11, %v2751_v20, 920167782 }
  0xca   :  { %v2813_v31 = vsel %vm2223_vm10, 0, %v2222_v55  ;;  %v2816_v6 = vmul.f32 %v2578_v9, %v77_v52  ;;  %v2820_v60 = vsel %vm128_vm11, %v124_v49, 1326507024  ;;  %v668_v24 = vmul.u32 %v661_v45, %v652_v56 }
  0xcb   :  { %vm670_vm12 = vc.u32 %v2796_v59, %v2786_v10  ;;  %v519_v22 = vadd.s32 1, %v2232_v34  ;;  %v374_v28 = vshll.u32 %v2652_v8, %v2735_v61  ;;  %v481_v48 = vsub.s32 4294967266, %v2803_v62  ;;  %v926_v61 = vld [vmem:[%s3507_s3 + $0x8] sm:$0xff] }
  0xcc   :  { %v672_v2 = vsel %vm670_vm12, %v671_v13, %v2787_v3  ;;  %v517_v40 = vor.u32 8388608, %v516_v29  ;;  %v2828_v43 = vor.u32 4788187, %v379_v14  ;;  %v273_v0 = vsub.s32 4294967266, %v2813_v31  ;;  %2366 = vmatprep.subr.mxu1 %v926_v61 }
  0xcd   :  { %v673_v44 = vadd.s32 %v672_v2, %v668_v24  ;;  %vm520_vm13 = vcmp.gt.s32.totalorder %v519_v22, 0  ;;  %v2831_v25 = vor.u32 %v375_v15, %v374_v28  ;;  %v2835_v45 = vadd.s32 %v2660_v19, %v2656_v12  ;;  %2367 = vmatpush3.msra.mxu1 %v926_v61 }
  0xce   :  { %v521_v47 = vsel %vm520_vm13, %v519_v22, 0  ;;  %v824_v8 = vand.u32 2139095040, %v2816_v6  ;;  %v477_v3 = vsub.s32 32, %v2803_v62  ;;  %v253_v12 = vadd.s32 %v2702_v21, %v2700_v38  ;;  %2368 = vmatprep.subr.mxu1 %v925_v1 }
  0xcf   :  { %v674_v19 = vadd.s32 536870912, %v673_v44  ;;  %v523_v55 = vand.u32 31, %v521_v47  ;;  %v2850_v18 = vadd.s32 127, %v481_v48  ;;  %v269_v54 = vsub.s32 32, %v2813_v31  ;;  %2369 = vmatpush3.msra.mxu1 %v925_v1 }
  0xd0   :  { %v2853_v49 = vshll.u32 %v517_v40, 8  ;;  %v3525_v51 = vand.u32 2147483647, %v2816_v6  ;;  %v270_v52 = vshll.u32 %v2774_v53, %v2813_v31  ;;  %v274_v56 = vadd.s32 127, %v273_v0 }
  0xd1   :  { %v2858_v34 = vshrl.u32 %v674_v19, 30  ;;  %v524_v38 = vsub.s32 32, %v523_v55  ;;  %v522_v21 = vshrl.u32 %v521_v47, 5  ;;  %v526_v29 = vshll.u32 %v2497_v33, %v523_v55 }
  0xd2   :  { %v529_v14 = vshll.u32 %v3523_v35, %v523_v55  ;;  %v825_v13 = vshrl.u32 %v824_v8, 23  ;;  %v532_v53 = vshll.u32 %v3519_v37, %v523_v55  ;;  %v535_v28 = vshll.u32 %v3521_v39, %v523_v55 }
  0xd3   :  { %3536 = vst [vmem:[#allocation6_spill] sm:$0xff] %v2858_v34  ;;  %v676_v15 = vshll.u32 %v2858_v34, 30  ;;  %v527_v24 = vshrl.u32 %v3523_v35, %v524_v38  ;;  %v530_v22 = vshrl.u32 %v3519_v37, %v524_v38  ;;  %v533_v31 = vshrl.u32 %v3521_v39, %v524_v38 }
  0xd4   :  { %v536_v48 = vshrl.u32 %v2501_v41, %v524_v38  ;;  %v539_v2 = vshrl.u32 %v2502_v50, %v524_v38  ;;  %v538_v8 = vshll.u32 %v2501_v41, %v523_v55  ;;  %v271_v61 = vshrl.u32 %v253_v12, %v269_v54 }
  0xd5   :  { %v2870_v40 = vsub.s32 %v673_v44, %v676_v15  ;;  %v528_v0 = vor.u32 %v527_v24, %v526_v29  ;;  %v531_v47 = vor.u32 %v530_v22, %v529_v14  ;;  %v275_v58 = vshll.u32 %v274_v56, 23  ;;  %v72_v24 = vpop.permute.xlu0 %71 }
  0xd6   :  { %v534_v1 = vor.u32 %v533_v31, %v532_v53  ;;  %v537_v19 = vor.u32 %v536_v48, %v535_v28  ;;  %v540_v37 = vor.u32 %v539_v2, %v538_v8  ;;  %vm541_vm14 = vcmp.lt.s32.totalorder %v522_v21, 1 }
  0xd7   :  { %v679_v4 = vsub.s32 0, %v2870_v40  ;;  %v828_v39 = vand.u32 8388607, %v3525_v51  ;;  %v525_v35 = vshrl.u32 %v2497_v33, %v524_v38  ;;  %vm544_vm15 = vcmp.lt.s32.totalorder %v522_v21, 4 }
  0xd8   :  { %v549_v44 = vsel %vm541_vm14, %v528_v0, %v531_v47  ;;  %v2244_v29 = vadd.s32 4294967169, %v825_v13  ;;  %vm543_vm0 = vcmp.lt.s32.totalorder %v522_v21, 3  ;;  %v546_v12 = vsel %vm544_vm15, %v534_v1, 2102212464 }
  0xd9   :  { %v2237_v14 = vmin.u32 %v679_v4, %v2870_v40  ;;  %v550_v55 = vsel %vm544_vm15, %v537_v19, 920167782  ;;  %v276_v54 = vor.u32 4788187, %v275_v58  ;;  %vm542_vm1 = vcmp.lt.s32.totalorder %v522_v21, 2 }
  0xda   :  { %v551_v56 = vsel %vm543_vm0, %v534_v1, %v550_v55  ;;  %v553_v15 = vsel %vm541_vm14, %v531_v47, %v534_v1  ;;  %v545_v53 = vsel %vm541_vm14, %v525_v35, %v528_v0  ;;  %v554_v31 = vsel %vm544_vm15, %v540_v37, 1326507024 }
  0xdb   :  { %v681_v22 = vclz %v2237_v14  ;;  %v552_v38 = vsel %vm542_vm1, %v549_v44, %v551_v56  ;;  %v547_v28 = vsel %vm543_vm0, %v531_v47, %v546_v12  ;;  %v555_v48 = vsel %vm543_vm0, %v537_v19, %v554_v31 }
  0xdc   :  { %v2883_v13 = vmul.u32.u64.low %v2853_v49, %v552_v38  ;;  %v2884_v4 = vmul.u32.u64.high %v2853_v49, %v552_v38, %v2883_v13  ;;  %v272_v2 = vor.u32 %v271_v61, %v270_v52  ;;  %v556_v8 = vsel %vm542_vm1, %v553_v15, %v555_v48 }
  0xdd   :  { %v831_v58 = vadd.s32 1, %v2244_v29  ;;  %v2889_v1 = vmul.f32 %v2578_v9, %v72_v24  ;;  %v2238_v35 = vadd.s32 4294967294, %v681_v22  ;;  %v479_v47 = vshrl.u32 %v2835_v45, %v477_v3 }
  0xde   :  { %v2893_v0 = vmul.u32.u64.low %v2853_v49, %v556_v8  ;;  %v2894_v37 = vmul.u32.u64.high %v2853_v49, %v556_v8, %v2893_v0  ;;  %v483_v19 = vshll.u32 %v2850_v18, 23  ;;  %v548_v52 = vsel %vm542_vm1, %v545_v53, %v547_v28 }
  0xdf   :  { %vm832_vm2 = vcmp.gt.s32.totalorder %v831_v58, 0  ;;  %v277_v61 = vand.u32 2147483647, %v276_v54  ;;  %v567_v9 = vadd.s32 1, %v2884_v4  ;;  %v829_v44 = vor.u32 8388608, %v828_v39 }
  0xe0   :  { %v833_v29 = vsel %vm832_vm2, %v831_v58, 0  ;;  %v478_v55 = vshll.u32 %v2706_v42, %v2803_v62  ;;  %v279_v56 = vcvt.s32.f32 %v272_v2  ;;  %v720_v15 = vand.u32 2139095040, %v2889_v1 }
  0xe1   :  { %vm2239_vm3 = vcmp.lt.s32.totalorder %v2238_v35, 0  ;;  %v564_v45 = vmul.u32 %v2853_v49, %v548_v52  ;;  %vm566_vm4 = vc.u32 %v2894_v37, %v2883_v13  ;;  %v835_v3 = vand.u32 31, %v833_v29 }
  0xe2   :  { %v2909_v18 = vor.u32 %v479_v47, %v478_v55  ;;  %v2911_v21 = vor.u32 4788187, %v483_v19  ;;  %v568_v39 = vsel %vm566_vm4, %v567_v9, %v2884_v4  ;;  %v3528_v54 = vand.u32 2147483647, %v2889_v1 }
  0xe3   :  { %v2915_v24 = vmul.f32 %v279_v56, %v277_v61  ;;  %v569_v42 = vadd.s32 %v568_v39, %v564_v45  ;;  %v836_v62 = vsub.s32 32, %v835_v3  ;;  %v2917_v22 = vshll.u32 %v829_v44, 8 }
  0xe4   :  { %v2919_v53 = vsel %vm2239_vm3, 0, %v2238_v35  ;;  %v834_v49 = vshrl.u32 %v833_v29, 5  ;;  %v838_v38 = vshll.u32 %v2497_v33, %v835_v3  ;;  %v721_v31 = vshrl.u32 %v720_v15, 23 }
  0xe5   :  { %v570_v28 = vadd.s32 536870912, %v569_v42  ;;  %v3537_v48 = vmov 2475754826   ;;  %v3538_v4 = vmov 2131351028   ;;  %v848_v35 = vshrl.u32 %v2501_v41, %v836_v62 }
  0xe6   :  { %v839_v2 = vshrl.u32 %v3537_v48, %v836_v62  ;;  %v841_v8 = vshll.u32 %v3537_v48, %v835_v3  ;;  %v842_v58 = vshrl.u32 %v3538_v4, %v836_v62  ;;  %v844_v0 = vshll.u32 %v3538_v4, %v835_v3 }
  0xe7   :  { %v3539_v47 = vmov 2102212464   ;;  %v689_v61 = vsub.s32 4294967266, %v2919_v53  ;;  %v2930_v9 = vshrl.u32 %v570_v28, 30  ;;  %v850_v15 = vshll.u32 %v2501_v41, %v835_v3 }
  0xe8   :  { %v845_v19 = vshrl.u32 %v3539_v47, %v836_v62  ;;  %v847_v52 = vshll.u32 %v3539_v47, %v835_v3  ;;  %v840_v44 = vor.u32 %v839_v2, %v838_v38  ;;  %v843_v29 = vor.u32 %v842_v58, %v841_v8 }
  0xe9   :  { %3540 = vst [vmem:[#allocation7_spill] sm:$0xff] %v2930_v9  ;;  %v851_v45 = vshrl.u32 %v2502_v50, %v836_v62  ;;  %v572_v39 = vshll.u32 %v2930_v9, 30  ;;  %vm853_vm5 = vcmp.lt.s32.totalorder %v834_v49, 1  ;;  %v2240_v51 = vadd.s32 4294967169, %v721_v31 }
  0xea   :  { %v846_v55 = vor.u32 %v845_v19, %v844_v0  ;;  %v849_v56 = vor.u32 %v848_v35, %v847_v52  ;;  %v724_v14 = vand.u32 8388607, %v3528_v54  ;;  %v837_v12 = vshrl.u32 %v2497_v33, %v836_v62 }
  0xeb   :  { %v852_v34 = vor.u32 %v851_v45, %v850_v15  ;;  %vm855_vm6 = vcmp.lt.s32.totalorder %v834_v49, 3  ;;  %vm856_vm7 = vcmp.lt.s32.totalorder %v834_v49, 4  ;;  %v2938_v38 = vsub.s32 %v569_v42, %v572_v39 }
  0xec   :  { %v858_v28 = vsel %vm856_vm7, %v846_v55, 2102212464  ;;  %v861_v2 = vsel %vm853_vm5, %v840_v44, %v843_v29  ;;  %v862_v3 = vsel %vm856_vm7, %v849_v56, 920167782  ;;  %vm199_vm8 = vcmp.lt.s32.totalorder %v2595_v26, 0 }
  0xed   :  { %v690_v8 = vadd.s32 127, %v689_v61  ;;  %vm854_vm9 = vcmp.lt.s32.totalorder %v834_v49, 2  ;;  %v863_v31 = vsel %vm855_vm6, %v846_v55, %v862_v3  ;;  %v865_v58 = vsel %vm853_vm5, %v843_v29, %v846_v55 }
  0xee   :  { %v575_v0 = vsub.s32 0, %v2938_v38  ;;  %v857_v62 = vsel %vm853_vm5, %v837_v12, %v840_v44  ;;  %v864_v19 = vsel %vm854_vm9, %v861_v2, %v863_v31  ;;  %v866_v42 = vsel %vm856_vm7, %v852_v34, 1326507024 }
  0xef   :  { %v859_v52 = vsel %vm855_vm6, %v843_v29, %v858_v28  ;;  %v867_v35 = vsel %vm855_vm6, %v849_v56, %v866_v42  ;;  %v2950_v15 = vmul.u32.u64.low %v2917_v22, %v864_v19  ;;  %v2951_v45 = vmul.u32.u64.high %v2917_v22, %v864_v19, %v2950_v15 }
  0xf0   :  { %v487_v61 = vcvt.s32.f32 %v2909_v18  ;;  %v2233_v55 = vmin.u32 %v575_v0, %v2938_v38  ;;  %v868_v39 = vsel %vm854_vm9, %v865_v58, %v867_v35  ;;  %v485_v44 = vand.u32 2147483647, %v2911_v21 }
  0xf1   :  { %v2960_v34 = vmul.u32.u64.low %v2917_v22, %v868_v39  ;;  %v2961_v29 = vmul.u32.u64.high %v2917_v22, %v868_v39, %v2960_v34  ;;  %v727_v56 = vadd.s32 1, %v2240_v51  ;;  %v281_v28 = vxor.u32 2147483648, %v2915_v24 }
  0xf2   :  { %v685_v2 = vsub.s32 32, %v2919_v53  ;;  %v577_v3 = vclz %v2233_v55  ;;  %v860_v18 = vsel %vm854_vm9, %v857_v62, %v859_v52  ;;  %v691_v31 = vshll.u32 %v690_v8, 23 }
  0xf3   :  { %v879_v0 = vadd.s32 1, %v2951_v45  ;;  %v725_v58 = vor.u32 8388608, %v724_v14  ;;  %vm728_vm10 = vcmp.gt.s32.totalorder %v727_v56, 0  ;;  %v3541_v19 = vand.u32 2147483647, %v2828_v43 }
  0xf4   :  { %v3542_v21 = vcvt.s32.f32 %v2831_v25  ;;  %v669_v51 = vadd.s32 %v2786_v10, %v2796_v59  ;;  %v2234_v35 = vadd.s32 4294967294, %v577_v3  ;;  %v729_v39 = vsel %vm728_vm10, %v727_v56, 0 }
  0xf5   :  { %v2975_v34 = vmul.f32 %v487_v61, %v485_v44  ;;  %v876_v49 = vmul.u32 %v2917_v22, %v860_v18  ;;  %vm878_vm12 = vc.u32 %v2961_v29, %v2950_v15  ;;  %v731_v14 = vand.u32 31, %v729_v39 }
  0xf6   :  { %v2971_v42 = vmul.f32 %v3542_v21, %v3541_v19  ;;  %v2983_v43 = vsel %vm199_vm8, %v281_v28, %v2915_v24  ;;  %v2987_v8 = vshrl.u32 %v669_v51, %v685_v2  ;;  %v880_v10 = vsel %vm878_vm12, %v879_v0, %v2951_v45 }
  0xf7   :  { %v2990_v59 = vor.u32 4788187, %v691_v31  ;;  %v881_v62 = vadd.s32 %v880_v10, %v876_v49  ;;  %v732_v22 = vsub.s32 32, %v731_v14  ;;  %v2992_v52 = vshll.u32 %v725_v58, 8 }
  0xf8   :  { %vm2235_vm13 = vcmp.lt.s32.totalorder %v2234_v35, 0  ;;  %v110_v61 = vshll.u32 %v2497_v33, %v2695_v27  ;;  %v111_v24 = vshrl.u32 %v3537_v48, %v2718_v46  ;;  %v113_v55 = vshll.u32 %v3537_v48, %v2695_v27 }
  0xf9   :  { %v882_v44 = vadd.s32 536870912, %v881_v62  ;;  %v734_v56 = vshll.u32 %v2497_v33, %v731_v14  ;;  %v735_v45 = vshrl.u32 %v3537_v48, %v732_v22  ;;  %v738_v28 = vshrl.u32 %v3538_v4, %v732_v22 }
  0xfa   :  { %v737_v2 = vshll.u32 %v3537_v48, %v731_v14  ;;  %v740_v3 = vshll.u32 %v3538_v4, %v731_v14  ;;  %v741_v18 = vshrl.u32 %v3539_v47, %v732_v22  ;;  %v114_v31 = vshrl.u32 %v3538_v4, %v2718_v46 }
  0xfb   :  { %v3008_v0 = vsel %vm2235_vm13, 0, %v2234_v35  ;;  %v3010_v58 = vshrl.u32 %v882_v44, 30  ;;  %v730_v19 = vshrl.u32 %v729_v39, 5  ;;  %v736_v21 = vor.u32 %v735_v45, %v734_v56 }
  0xfc   :  { %v739_v51 = vor.u32 %v738_v28, %v737_v2  ;;  %v742_v49 = vor.u32 %v741_v18, %v740_v3  ;;  %v743_v10 = vshll.u32 %v3539_v47, %v731_v14  ;;  %v744_v54 = vshrl.u32 %v2501_v41, %v732_v22 }
  0xfd   :  { %3543 = vst [vmem:[#allocation8_spill] sm:$0xff] %v3010_v58  ;;  %v3544_v48 = vand.u32 2147483647, %v2595_v26  ;;  %v884_v25 = vshll.u32 %v3010_v58, 30  ;;  %v746_v35 = vshll.u32 %v2501_v41, %v731_v14  ;;  %v747_v44 = vshrl.u32 %v2502_v50, %v732_v22 }
  0xfe   :  { %v116_v39 = vshll.u32 %v3538_v4, %v2695_v27  ;;  %v585_v56 = vsub.s32 4294967266, %v3008_v0  ;;  %v733_v45 = vshrl.u32 %v2497_v33, %v732_v22  ;;  %v745_v28 = vor.u32 %v744_v54, %v743_v10 }
  0xff   :  { %vm3016_vm14 = vcmp.le.f32.partialorder %v3544_v48, 0.7853982  ;;  %v112_v2 = vor.u32 %v111_v24, %v110_v61  ;;  %v3027_v3 = vsub.s32 %v881_v62, %v884_v25  ;;  %v748_v18 = vor.u32 %v747_v44, %v746_v35 }
 0x100   :  { %vm749_vm15 = vcmp.lt.s32.totalorder %v730_v19, 1  ;;  %vm752_vm0 = vcmp.lt.s32.totalorder %v730_v19, 4  ;;  %vm751_vm1 = vcmp.lt.s32.totalorder %v730_v19, 3  ;;  %vm750_vm2 = vcmp.lt.s32.totalorder %v730_v19, 2 }
 0x101   :  { %v753_v48 = vsel %vm749_vm15, %v733_v45, %v736_v21  ;;  %v754_v58 = vsel %vm752_vm0, %v742_v49, 2102212464  ;;  %v757_v41 = vsel %vm749_vm15, %v736_v21, %v739_v51  ;;  %v887_v50 = vsub.s32 0, %v3027_v3 }
 0x102   :  { %v755_v14 = vsel %vm751_vm1, %v739_v51, %v754_v58  ;;  %v758_v9 = vsel %vm752_vm0, %v745_v28, 920167782  ;;  %v761_v27 = vsel %vm749_vm15, %v739_v51, %v742_v49  ;;  %v762_v63 = vsel %vm752_vm0, %v748_v18, 1326507024 }
 0x103   :  { %v759_v4 = vsel %vm751_vm1, %v742_v49, %v758_v9  ;;  %v115_v22 = vor.u32 %v114_v31, %v113_v55  ;;  %v586_v54 = vadd.s32 127, %v585_v56  ;;  %v2245_v25 = vmin.u32 %v887_v50, %v3027_v3 }
 0x104   :  { %v760_v62 = vsel %vm750_vm2, %v757_v41, %v759_v4  ;;  %v763_v61 = vsel %vm751_vm1, %v745_v28, %v762_v63  ;;  %v756_v24 = vsel %vm750_vm2, %v753_v48, %v755_v14  ;;  %v117_v9 = vshrl.u32 %v3539_v47, %v2718_v46 }
 0x105   :  { %v764_v10 = vsel %vm750_vm2, %v761_v27, %v763_v61  ;;  %v3032_v35 = vmul.u32.u64.low %v2992_v52, %v760_v62  ;;  %v3033_v44 = vmul.u32.u64.high %v2992_v52, %v760_v62, %v3032_v35  ;;  %v889_v21 = vclz %v2245_v25 }
 0x106   :  { %v3037_v58 = vmul.u32.u64.low %v2992_v52, %v764_v10  ;;  %v3038_v51 = vmul.u32.u64.high %v2992_v52, %v764_v10, %v3037_v58  ;;  %v285_v63 = vsel %vm3016_vm14, %v2595_v26, %v2983_v43  ;;  %v565_v55 = vadd.s32 %v2883_v13, %v2894_v37 }
 0x107   :  { %v581_v31 = vsub.s32 32, %v3008_v0  ;;  %v109_v19 = vshrl.u32 %v2497_v33, %v2718_v46  ;;  %v3547_v49 = vshll.u32 %v2870_v40, %v2919_v53  ;;  %v693_v47 = vand.u32 2147483647, %v2990_v59 }
 0x108   :  { %v2246_v45 = vadd.s32 4294967294, %v889_v21  ;;  %v118_v28 = vor.u32 %v117_v9, %v116_v39  ;;  %v587_v18 = vshll.u32 %v586_v54, 23  ;;  %v772_v43 = vmul.u32 %v2992_v52, %v756_v24 }
 0x109   :  { %v688_v56 = vor.u32 %v2987_v8, %v3547_v49  ;;  %v775_v48 = vadd.s32 1, %v3033_v44  ;;  %vm125_vm3 = vcmp.lt.s32.totalorder %v2740_v5, 1  ;;  %vm774_vm5 = vc.u32 %v3038_v51, %v3032_v35 }
 0x10a   :  { %vm2247_vm4 = vcmp.lt.s32.totalorder %v2246_v45, 0  ;;  %vm127_vm6 = vcmp.lt.s32.totalorder %v2740_v5, 3  ;;  %v133_v33 = vsel %vm125_vm3, %v112_v2, %v115_v22  ;;  %vm303_vm7 = vcmp.lt.s32.totalorder %v2581_v11, 0 }
 0x10b   :  { %v583_v46 = vshrl.u32 %v565_v55, %v581_v31  ;;  %v3065_v40 = vsel %vm2247_vm4, 0, %v2246_v45  ;;  %v776_v13 = vsel %vm774_vm5, %v775_v48, %v3033_v44  ;;  %v135_v37 = vsel %vm127_vm6, %v118_v28, %v2811_v7 }
 0x10c   :  { %v777_v53 = vadd.s32 %v776_v13, %v772_v43  ;;  %vm126_vm9 = vcmp.lt.s32.totalorder %v2740_v5, 2  ;;  %v130_v8 = vsel %vm128_vm11, %v118_v28, 2102212464  ;;  %v139_v59 = vsel %vm127_vm6, %v2751_v20, %v2820_v60 }
 0x10d   :  { %v897_v52 = vsub.s32 4294967266, %v3065_v40  ;;  %v136_v39 = vsel %vm126_vm9, %v133_v33, %v135_v37  ;;  %v137_v41 = vsel %vm125_vm3, %v115_v22, %v118_v28  ;;  %v3548_v7 = vor.u32 8388608, %v2748_v16 }
 0x10e   :  { %v582_v14 = vshll.u32 %v2938_v38, %v3008_v0  ;;  %v588_v27 = vor.u32 4788187, %v587_v18  ;;  %v778_v4 = vadd.s32 536870912, %v777_v53  ;;  %v129_v54 = vsel %vm125_vm3, %v109_v19, %v112_v2 }
 0x10f   :  { %v141_v50 = vshll.u32 %v3548_v7, 8  ;;  %v131_v20 = vsel %vm127_vm6, %v115_v22, %v130_v8  ;;  %v140_v60 = vsel %vm126_vm9, %v137_v41, %v139_v59  ;;  %v385_v16 = vxor.u32 2147483648, %v2971_v42 }
 0x110   :  { %vm407_vm11 = vcmp.lt.s32.totalorder %v2586_v17, 0  ;;  %v695_v38 = vcvt.s32.f32 %v688_v56  ;;  %v3099_v0 = vshrl.u32 %v778_v4, 30  ;;  %v584_v61 = vor.u32 %v583_v46, %v582_v14 }
 0x111   :  { %v3093_v25 = vmul.u32.u64.low %v141_v50, %v136_v39  ;;  %v3094_v62 = vmul.u32.u64.high %v141_v50, %v136_v39, %v3093_v25  ;;  %v898_v24 = vadd.s32 127, %v897_v52  ;;  %v489_v22 = vxor.u32 2147483648, %v2975_v34 }
 0x112   :  { %v3101_v2 = vmul.u32.u64.low %v141_v50, %v140_v60  ;;  %v3102_v10 = vmul.u32.u64.high %v141_v50, %v140_v60, %v3101_v2  ;;  %2426 = vcosq.f32 %v285_v63  ;;  %v780_v44 = vshll.u32 %v3099_v0, 30 }
 0x113   :  { %v132_v21 = vsel %vm126_vm9, %v129_v54, %v131_v20  ;;  %v696_v58 = vmul.f32 %v695_v38, %v693_v47  ;;  %v589_v9 = vand.u32 2147483647, %v588_v27  ;;  %v893_v55 = vsub.s32 32, %v3065_v40 }
 0x114   :  { %v151_v31 = vadd.s32 1, %v3094_v62  ;;  %v386_v19 = vsel %vm303_vm7, %v385_v16, %v2971_v42  ;;  %2428 = vsinq.f32 %v285_v63  ;;  %v877_v49 = vadd.s32 %v2950_v15, %v2961_v29 }
 0x115   :  { %v3115_v56 = vsub.s32 %v777_v53, %v780_v44  ;;  %v591_v45 = vcvt.s32.f32 %v584_v61  ;;  %v899_v28 = vshll.u32 %v898_v24, 23  ;;  %v148_v5 = vmul.u32 %v141_v50, %v132_v21 }
 0x116   :  { %vm150_vm10 = vc.u32 %v3102_v10, %v3093_v25  ;;  %v3549_v47 = vand.u32 2147483647, %v2581_v11  ;;  %v490_v42 = vsel %vm407_vm11, %v489_v22, %v2975_v34  ;;  %v697_v63 = vxor.u32 2147483648, %v696_v58 }
 0x117   :  { %v783_v15 = vsub.s32 0, %v3115_v56  ;;  %v152_v29 = vsel %vm150_vm10, %v151_v31, %v3094_v62  ;;  %v592_v43 = vmul.f32 %v591_v45, %v589_v9  ;;  %v895_v48 = vshrl.u32 %v877_v49, %v893_v55 }
 0x118   :  { %vm3121_vm12 = vcmp.le.f32.partialorder %v3549_v47, 0.7853982  ;;  %v153_v33 = vadd.s32 %v152_v29, %v148_v5  ;;  %v3552_v13 = vand.u32 2147483647, %v2586_v17  ;;  %v894_v53 = vshll.u32 %v3027_v3, %v3065_v40 }
 0x119   :  { %v389_v46 = vsel %vm3121_vm12, %v2581_v11, %v386_v19  ;;  %v2241_v34 = vmin.u32 %v783_v15, %v3115_v56  ;;  %v900_v8 = vor.u32 4788187, %v899_v28  ;;  %v283_v52 = vsub.s32 4, %v2760_v32 }
 0x11a   :  { %vm3135_vm13 = vcmp.le.f32.partialorder %v3552_v13, 0.7853982  ;;  %v154_v59 = vadd.s32 536870912, %v153_v33  ;;  %vm615_vm15 = vcmp.lt.s32.totalorder %v2667_v30, 0  ;;  %v593_v50 = vxor.u32 2147483648, %v592_v43 }
 0x11b   :  { %v493_v39 = vsel %vm3135_vm13, %v2586_v17, %v490_v42  ;;  %v785_v41 = vclz %v2241_v34  ;;  %v698_v7 = vsel %vm615_vm15, %v697_v63, %v696_v58  ;;  %v896_v14 = vor.u32 %v895_v48, %v894_v53 }
 0x11c   :  { %v3149_v27 = vshrl.u32 %v154_v59, 30  ;;  %2430 = vcosq.f32 %v389_v46  ;;  %v3555_v3 = vand.u32 2147483647, %v2667_v30  ;;  %v901_v54 = vand.u32 2147483647, %v900_v8 }
 0x11d   :  { %v2242_v4 = vadd.s32 4294967294, %v785_v41  ;;  %2432 = vsinq.f32 %v389_v46  ;;  %v284_v60 = vsel %vm199_vm8, %v283_v52, %v2760_v32  ;;  %vm511_vm1 = vcmp.lt.s32.totalorder %v2764_v36, 0 }
 0x11e   :  { %vm3153_vm0 = vcmp.le.f32.partialorder %v3555_v3, 0.7853982  ;;  %v156_v20 = vshll.u32 %v3149_v27, 30  ;;  %2434 = vcosq.f32 %v493_v39  ;;  %v594_v38 = vsel %vm511_vm1, %v593_v50, %v592_v43 }
 0x11f   :  { %v701_v62 = vsel %vm3153_vm0, %v2667_v30, %v698_v7  ;;  %vm2243_vm2 = vcmp.lt.s32.totalorder %v2242_v4, 0  ;;  %v3165_v16 = vpop.eup %2426  ;;  %v903_v61 = vcvt.s32.f32 %v896_v14  ;;  %v773_v32 = vadd.s32 %v3032_v35, %v3038_v51 }
 0x120   :  { %v788_v24 = vsel %vm2243_vm2, 0, %v2242_v4  ;;  %v3169_v2 = vsub.s32 %v153_v33, %v156_v20  ;;  %v286_v21 = vsel %vm3016_vm14, 0, %v284_v60  ;;  %2436 = vsinq.f32 %v493_v39 }
 0x121   :  { %v789_v22 = vsub.s32 32, %v788_v24  ;;  %v793_v44 = vsub.s32 4294967266, %v788_v24  ;;  %v3175_v58 = vpop.eup %2428  ;;  %v3558_v9 = vand.u32 2147483647, %v2764_v36  ;;  %v904_v31 = vmul.f32 %v903_v61, %v901_v54 }
 0x122   :  { %v159_v19 = vsub.s32 0, %v3169_v2  ;;  %2438 = vcosq.f32 %v701_v62  ;;  %v790_v49 = vshll.u32 %v3115_v56, %v788_v24  ;;  %v1125_v28 = vand.u32 3, %v286_v21 }
 0x123   :  { %vm3179_vm8 = vcmp.le.f32.partialorder %v3558_v9, 0.7853982  ;;  %v791_v51 = vshrl.u32 %v773_v32, %v789_v22  ;;  %v794_v12 = vadd.s32 127, %v793_v44  ;;  %v387_v5 = vsub.s32 4, %v2640_v57  ;;  %v3567_v22 = vld [vmem:[#allocation5_spill] sm:$0xff] }
 0x124   :  { %v597_v35 = vsel %vm3179_vm8, %v2764_v36, %v594_v38  ;;  %v2217_v45 = vmin.u32 %v159_v19, %v3169_v2  ;;  %2440 = vsinq.f32 %v701_v62  ;;  %v294_v42 = vxor.u32 2147483648, %v3175_v58 }
 0x125   :  { %v795_v47 = vshll.u32 %v794_v12, 23  ;;  %v290_v15 = vadd.s32 3, %v286_v21  ;;  %v905_v29 = vxor.u32 2147483648, %v904_v31  ;;  %v792_v63 = vor.u32 %v791_v51, %v790_v49 }
 0x126   :  { %vm95_vm14 = vcmp.lt.s32.totalorder %v2592_v23, 0  ;;  %v161_v43 = vclz %v2217_v45  ;;  %v297_v48 = vxor.u32 2147483648, %v3165_v16  ;;  %2442 = vcosq.f32 %v597_v35 }
 0x127   :  { %v3561_v56 = vand.u32 2147483647, %v2816_v6  ;;  %vm823_vm4 = vcmp.lt.s32.totalorder %v2816_v6, 0  ;;  %v796_v46 = vor.u32 4788187, %v795_v47  ;;  %2444 = vsinq.f32 %v597_v35 }
 0x128   :  { %v2218_v13 = vadd.s32 4294967294, %v161_v43  ;;  %vm1127_vm5 = vcmp.eq.s32.totalorder %v1125_v28, 0  ;;  %v388_v34 = vsel %vm303_vm7, %v387_v5, %v2640_v57  ;;  %v3564_v8 = vand.u32 2147483647, %v2592_v23 }
 0x129   :  { %vm3195_vm3 = vcmp.le.f32.partialorder %v3561_v56, 0.7853982  ;;  %v797_v53 = vand.u32 2147483647, %v796_v46  ;;  %v1129_v52 = vsel %vm1127_vm5, %v3165_v16, %v294_v42  ;;  %vm1130_vm9 = vcmp.eq.s32.totalorder %v1125_v28, 2  ;;  %v3210_v41 = vpop.eup %2430 }
 0x12a   :  { %vm3205_vm6 = vcmp.le.f32.partialorder %v3564_v8, 0.7853982  ;;  %v291_v39 = vand.u32 3, %v290_v15  ;;  %v906_v7 = vsel %vm823_vm4, %v905_v29, %v904_v31  ;;  %v799_v50 = vcvt.s32.f32 %v792_v63  ;;  %v3215_v14 = vpop.eup %2432 }
 0x12b   :  { %vm2219_vm10 = vcmp.lt.s32.totalorder %v2218_v13, 0  ;;  %v1132_v57 = vsel %vm1130_vm9, %v297_v48, %v3175_v58  ;;  %vm719_vm7 = vcmp.lt.s32.totalorder %v2889_v1, 0  ;;  %v149_v3 = vadd.s32 %v3093_v25, %v3102_v10  ;;  %v3221_v20 = vpop.eup %2434 }
 0x12c   :  { %v164_v4 = vsel %vm2219_vm10, 0, %v2218_v13  ;;  %v179_v54 = vsub.s32 4, %v3149_v27  ;;  %vm1126_vm2 = vcmp.lt.s32.totalorder %v1125_v28, 2  ;;  %v800_v60 = vmul.f32 %v799_v50, %v797_v53 }
 0x12d   :  { %v165_v62 = vsub.s32 32, %v164_v4  ;;  %v169_v38 = vsub.s32 4294967266, %v164_v4  ;;  %v390_v61 = vsel %vm3121_vm12, 0, %v388_v34  ;;  %v909_v24 = vsel %vm3195_vm3, %v2816_v6, %v906_v7  ;;  %v3236_v18 = vpop.eup %2436 }
 0x12e   :  { %v1133_v32 = vsel %vm1126_vm2, %v1129_v52, %v1132_v57  ;;  %vm293_vm5 = vcmp.eq.s32.totalorder %v291_v39, 0  ;;  %v491_v25 = vsub.s32 4, %v3567_v22  ;;  %v3568_v10 = vand.u32 2147483647, %v2889_v1 }
 0x12f   :  { %v166_v21 = vshll.u32 %v3169_v2, %v164_v4  ;;  %v167_v9 = vshrl.u32 %v149_v3, %v165_v62  ;;  %v170_v31 = vadd.s32 127, %v169_v38  ;;  %vm296_vm10 = vcmp.eq.s32.totalorder %v291_v39, 2  ;;  %v3243_v49 = vpop.eup %2438 }
 0x130   :  { %vm3231_vm9 = vcmp.le.f32.partialorder %v3568_v10, 0.7853982  ;;  %v180_v19 = vsel %vm95_vm14, %v179_v54, %v3149_v27  ;;  %v295_v35 = vsel %vm293_vm5, %v3165_v16, %v294_v42  ;;  %v298_v51 = vsel %vm296_vm10, %v297_v48, %v3175_v58  ;;  %v3571_v48 = vld [vmem:[#allocation7_spill] sm:$0xff] }
 0x131   :  { %v394_v12 = vadd.s32 3, %v390_v61  ;;  %v801_v45 = vxor.u32 2147483648, %v800_v60  ;;  %v168_v28 = vor.u32 %v167_v9, %v166_v21  ;;  %v171_v5 = vshll.u32 %v170_v31, 23  ;;  %v3253_v16 = vpop.eup %2440 }
 0x132   :  { %vm289_vm12 = vweird.f32 %v2595_v26  ;;  %2446 = vcosq.f32 %v909_v24  ;;  %vm292_vm2 = vcmp.lt.s32.totalorder %v291_v39, 2  ;;  %v492_v27 = vsel %vm407_vm11, %v491_v25, %v3567_v22 }
 0x133   :  { %v3248_v2 = vsel %vm289_vm12, nan, %v1133_v32  ;;  %v172_v58 = vor.u32 4788187, %v171_v5  ;;  %v182_v47 = vsel %vm3205_vm6, 0, %v180_v19  ;;  %v299_v42 = vsel %vm292_vm2, %v295_v35, %v298_v51  ;;  %v3260_v46 = vpop.eup %2442 }
 0x134   :  { %v1228_v15 = vand.u32 3, %v390_v61  ;;  %v398_v29 = vxor.u32 2147483648, %v3215_v14  ;;  %v401_v63 = vxor.u32 2147483648, %v3210_v41  ;;  %v395_v43 = vand.u32 3, %v394_v12  ;;  %v3266_v52 = vpop.eup %2444 }
 0x135   :  { %v595_v56 = vsub.s32 4, %v3571_v48  ;;  %v802_v13 = vsel %vm719_vm7, %v801_v45, %v800_v60  ;;  %v173_v34 = vand.u32 2147483647, %v172_v58  ;;  %v175_v53 = vcvt.s32.f32 %v168_v28 }
 0x136   :  { %v494_v8 = vsel %vm3135_vm13, 0, %v492_v27  ;;  %2448 = vsinq.f32 %v909_v24  ;;  %v3268_v39 = vand.u32 3, %v182_v47  ;;  %v186_v7 = vadd.s32 3, %v182_v47  ;;  %v3572_v24 = vld [vmem:[#allocation6_spill] sm:$0xff] }
 0x137   :  { %v3272_v50 = vsel %vm289_vm12, nan, %v299_v42  ;;  %v176_v57 = vmul.f32 %v175_v53, %v173_v34  ;;  %vm1229_vm11 = vcmp.lt.s32.totalorder %v1228_v15, 2  ;;  %vm1230_vm5 = vcmp.eq.s32.totalorder %v1228_v15, 0 }
 0x138   :  { %vm1233_vm10 = vcmp.eq.s32.totalorder %v1228_v15, 2  ;;  %v805_v3 = vsel %vm3231_vm9, %v2889_v1, %v802_v13  ;;  %v1232_v37 = vsel %vm1230_vm5, %v3210_v41, %v398_v29  ;;  %v498_v4 = vadd.s32 3, %v494_v8  ;;  %v3573_v13 = vld [vmem:[#allocation8_spill] sm:$0xff] }
 0x139   :  { %v596_v54 = vsel %vm511_vm1, %v595_v56, %v3571_v48  ;;  %v177_v60 = vxor.u32 2147483648, %v176_v57  ;;  %vm393_vm13 = vweird.f32 %v2581_v11  ;;  %v1235_v26 = vsel %vm1233_vm10, %v401_v63, %v3215_v14 }
 0x13a   :  { %vm397_vm12 = vcmp.eq.s32.totalorder %v395_v43, 0  ;;  %vm400_vm2 = vcmp.eq.s32.totalorder %v395_v43, 2  ;;  %v1331_v61 = vand.u32 3, %v494_v8  ;;  %v699_v32 = vsub.s32 4, %v3572_v24 }
 0x13b   :  { %v399_v62 = vsel %vm397_vm12, %v3210_v41, %v398_v29  ;;  %v402_v38 = vsel %vm400_vm2, %v401_v63, %v3215_v14  ;;  %2450 = vsinq.f32 %v805_v3  ;;  %v178_v22 = vsel %vm95_vm14, %v177_v60, %v176_v57 }
 0x13c   :  { %v502_v25 = vxor.u32 2147483648, %v3236_v18  ;;  %v598_v10 = vsel %vm3179_vm8, 0, %v596_v54  ;;  %2452 = vcosq.f32 %v805_v3  ;;  %v181_v21 = vsel %vm3205_vm6, %v2592_v23, %v178_v22 }
 0x13d   :  { %v505_v41 = vxor.u32 2147483648, %v3221_v20  ;;  %v499_v14 = vand.u32 3, %v498_v4  ;;  %2454 = vcosq.f32 %v181_v21  ;;  %v3295_v9 = vand.u32 3, %v186_v7 }
 0x13e   :  { %v1236_v31 = vsel %vm1229_vm11, %v1232_v37, %v1235_v26  ;;  %vm396_vm1 = vcmp.lt.s32.totalorder %v395_v43, 2  ;;  %2456 = vsinq.f32 %v181_v21  ;;  %vm1333_vm14 = vcmp.eq.s32.totalorder %v1331_v61, 0 }
 0x13f   :  { %v602_v19 = vadd.s32 3, %v598_v10  ;;  %v700_v55 = vsel %vm615_vm15, %v699_v32, %v3572_v24  ;;  %v3301_v35 = vpop.eup %2446  ;;  %v403_v59 = vsel %vm396_vm1, %v399_v62, %v402_v38  ;;  %v1335_v51 = vsel %vm1333_vm14, %v3221_v20, %v502_v25 }
 0x140   :  { %vm1336_vm8 = vcmp.eq.s32.totalorder %v1331_v61, 2  ;;  %v803_v12 = vsub.s32 4, %v3099_v0  ;;  %vm501_vm6 = vcmp.eq.s32.totalorder %v499_v14, 0  ;;  %vm504_vm11 = vcmp.eq.s32.totalorder %v499_v14, 2 }
 0x141   :  { %v1338_v45 = vsel %vm1336_vm8, %v505_v41, %v3236_v18  ;;  %v1434_v28 = vand.u32 3, %v598_v10  ;;  %v503_v5 = vsel %vm501_vm6, %v3221_v20, %v502_v25  ;;  %v506_v27 = vsel %vm504_vm11, %v505_v41, %v3236_v18 }
 0x142   :  { %v606_v58 = vxor.u32 2147483648, %v3266_v52  ;;  %v702_v47 = vsel %vm3153_vm0, 0, %v700_v55  ;;  %v3313_v42 = vsel %vm393_vm13, nan, %v1236_v31  ;;  %v3317_v15 = vsel %vm393_vm13, nan, %v403_v59 }
 0x143   :  { %vm497_vm15 = vweird.f32 %v2586_v17  ;;  %v603_v29 = vand.u32 3, %v602_v19  ;;  %v3320_v63 = vpop.eup %2448  ;;  %vm1332_vm5 = vcmp.lt.s32.totalorder %v1331_v61, 2  ;;  %vm500_vm10 = vcmp.lt.s32.totalorder %v499_v14, 2 }
 0x144   :  { %v609_v20 = vxor.u32 2147483648, %v3260_v46  ;;  %v804_v40 = vsel %vm719_vm7, %v803_v12, %v3099_v0  ;;  %vm1027_vm0 = vcmp.eq.s32.totalorder %v3268_v39, 2  ;;  %vm192_vm12 = vcmp.eq.s32.totalorder %v3295_v9, 2 }
 0x145   :  { %v1339_v11 = vsel %vm1332_vm5, %v1335_v51, %v1338_v45  ;;  %v507_v18 = vsel %vm500_vm10, %v503_v5, %v506_v27  ;;  %vm1436_vm13 = vcmp.eq.s32.totalorder %v1434_v28, 0  ;;  %v706_v43 = vadd.s32 3, %v702_v47 }
 0x146   :  { %vm1024_vm2 = vcmp.eq.s32.totalorder %v3268_v39, 0  ;;  %vm189_vm1 = vcmp.eq.s32.totalorder %v3295_v9, 0  ;;  %v1438_v48 = vsel %vm1436_vm13, %v3260_v46, %v606_v58  ;;  %vm1439_vm14 = vcmp.eq.s32.totalorder %v1434_v28, 2 }
 0x147   :  { %v3331_v56 = vand.u32 3, %v702_v47  ;;  %v907_v34 = vsub.s32 4, %v3573_v13  ;;  %vm1023_vm7 = vcmp.lt.s32.totalorder %v3268_v39, 2  ;;  %vm1757_vm8 = vcmask 261120  }
 0x148   :  { %vm188_vm6 = vcmp.lt.s32.totalorder %v3295_v9, 2  ;;  %vm605_vm11 = vcmp.eq.s32.totalorder %v603_v29, 0  ;;  %vm608_vm5 = vcmp.eq.s32.totalorder %v603_v29, 2  ;;  %v710_v0 = vxor.u32 2147483648, %v3253_v16  ;;  %v2451_v37 = vpop.eup %2450 }
 0x149   :  { %v806_v53 = vsel %vm3231_vm9, 0, %v804_v40  ;;  %vm185_vm10 = vweird.f32 %v2592_v23  ;;  %v1441_v8 = vsel %vm1439_vm14, %v609_v20, %v3266_v52  ;;  %v607_v7 = vsel %vm605_vm11, %v3260_v46, %v606_v58  ;;  %v2453_v26 = vpop.eup %2452 }
 0x14a   :  { %v610_v57 = vsel %vm608_vm5, %v609_v20, %v3266_v52  ;;  %v713_v3 = vxor.u32 2147483648, %v3243_v49  ;;  %v3346_v4 = vsel %vm497_vm15, nan, %v1339_v11  ;;  %v3350_v54 = vsel %vm497_vm15, nan, %v507_v18  ;;  %v2455_v52 = vpop.eup %2454 }
 0x14b   :  { %v707_v44 = vand.u32 3, %v706_v43  ;;  %v908_v60 = vsel %vm823_vm4, %v907_v34, %v3573_v13  ;;  %vm1435_vm9 = vcmp.lt.s32.totalorder %v1434_v28, 2  ;;  %vm604_vm13 = vcmp.lt.s32.totalorder %v603_v29, 2  ;;  %v2457_v61 = vpop.eup %2456 }
 0x14c   :  { %vm1539_vm14 = vcmp.eq.s32.totalorder %v3331_v56, 0  ;;  %v810_v46 = vadd.s32 3, %v806_v53  ;;  %vm601_vm11 = vweird.f32 %v2764_v36  ;;  %v1442_v62 = vsel %vm1435_vm9, %v1438_v48, %v1441_v8 }
 0x14d   :  { %v611_v38 = vsel %vm604_vm13, %v607_v7, %v610_v57  ;;  %v1541_v17 = vsel %vm1539_vm14, %v3243_v49, %v710_v0  ;;  %vm1542_vm15 = vcmp.eq.s32.totalorder %v3331_v56, 2  ;;  %v193_v24 = vxor.u32 2147483648, %v2455_v52  ;;  %v2315_v57 = vld [vmem:[%s3505_s1 + $0x8] sm:$0xff]  }
 0x14e   :  { %v1544_v32 = vsel %vm1542_vm15, %v713_v3, %v3253_v16  ;;  %v814_v22 = vxor.u32 2147483648, %v2451_v37  ;;  %v910_v25 = vsel %vm3195_vm3, 0, %v908_v60  ;;  %v190_v10 = vxor.u32 2147483648, %v2457_v61 }
 0x14f   :  { %vm709_vm4 = vcmp.eq.s32.totalorder %v707_v44, 0  ;;  %v817_v21 = vxor.u32 2147483648, %v2453_v26  ;;  %v1640_v41 = vand.u32 3, %v806_v53  ;;  %v1029_v14 = vsel %vm1027_vm0, %v193_v24, %v2457_v61 }
 0x150   :  { %v194_v31 = vsel %vm192_vm12, %v193_v24, %v2457_v61  ;;  %vm712_vm5 = vcmp.eq.s32.totalorder %v707_v44, 2  ;;  %v811_v19 = vand.u32 3, %v810_v46  ;;  %v1026_v55 = vsel %vm1024_vm2, %v2455_v52, %v190_v10  ;;  %v2316_v24 = vld [vmem:[%s3505_s1 + $0x10] sm:$0xff]  }
 0x151   :  { %v191_v59 = vsel %vm189_vm1, %v2455_v52, %v190_v10  ;;  %v711_v33 = vsel %vm709_vm4, %v3243_v49, %v710_v0  ;;  %v914_v51 = vadd.s32 3, %v910_v25  ;;  %v1030_v12 = vsel %vm1023_vm7, %v1026_v55, %v1029_v14 }
 0x152   :  { %v195_v45 = vsel %vm188_vm6, %v191_v59, %v194_v31  ;;  %v714_v28 = vsel %vm712_vm5, %v713_v3, %v3253_v16  ;;  %v918_v5 = vxor.u32 2147483648, %v3320_v63  ;;  %v1031_v27 = vsel %vm185_vm10, nan, %v1030_v12  ;;  %v2317_v12 = vld [vmem:[%s3505_s1 + $0x18] sm:$0xff]  }
 0x153   :  { %v196_v58 = vsel %vm185_vm10, nan, %v195_v45  ;;  %vm1642_vm3 = vcmp.eq.s32.totalorder %v1640_v41, 0  ;;  %vm1645_vm0 = vcmp.eq.s32.totalorder %v1640_v41, 2  ;;  %2350 = vmatprep.mubr.msk.f32.mxu0 %vm1757_vm8, %v1031_v27  ;;  %vm813_vm12 = vcmp.eq.s32.totalorder %v811_v19, 0 }
 0x154   :  { %2370 = vmatprep.mubr.msk.f32.mxu1 %vm1757_vm8, %v196_v58  ;;  %v1644_v49 = vsel %vm1642_vm3, %v2453_v26, %v814_v22  ;;  %vm816_vm2 = vcmp.eq.s32.totalorder %v811_v19, 2  ;;  %v1743_v39 = vand.u32 3, %v910_v25  ;;  %2351 = vmatmul.mubr.msk.f32.vlgmr.msra.gmra.mxu0 %vm1757_vm8, %v3248_v2  ;;  %v1647_v16 = vsel %vm1645_vm0, %v817_v21, %v2451_v37 }
 0x155   :  { %2371 = vmatmul.mubr.msk.f32.vlgmr.msra.gmra.mxu1 %vm1757_vm8, %v3272_v50  ;;  %v815_v9 = vsel %vm813_vm12, %v2453_v26, %v814_v22  ;;  %v818_v23 = vsel %vm816_vm2, %v817_v21, %v2451_v37  ;;  %v915_v47 = vand.u32 3, %v914_v51  ;;  %2353 = vmatprep.mubr.msk.f32.mxu0 %vm1757_vm8, %v3313_v42  ;;  %v1443_v29 = vsel %vm601_vm11, nan, %v1442_v62 }
 0x156   :  { %2373 = vmatprep.mubr.msk.f32.mxu1 %vm1757_vm8, %v3317_v15  ;;  %v612_v20 = vsel %vm601_vm11, nan, %v611_v38  ;;  %vm1538_vm1 = vcmp.lt.s32.totalorder %v3331_v56, 2  ;;  %v921_v2 = vxor.u32 2147483648, %v3301_v35  ;;  %vm708_vm7 = vcmp.lt.s32.totalorder %v707_v44, 2 }
 0x157   :  { %v1545_v50 = vsel %vm1538_vm1, %v1541_v17, %v1544_v32  ;;  %vm1641_vm6 = vcmp.lt.s32.totalorder %v1640_v41, 2  ;;  %vm812_vm10 = vcmp.lt.s32.totalorder %v811_v19, 2  ;;  %v715_v40 = vsel %vm708_vm7, %v711_v33, %v714_v28 }
 0x158   :  { %v1648_v11 = vsel %vm1641_vm6, %v1644_v49, %v1647_v16  ;;  %v819_v42 = vsel %vm812_vm10, %v815_v9, %v818_v23  ;;  %vm1745_vm9 = vcmp.eq.s32.totalorder %v1743_v39, 0  ;;  %2354 = vmatmul.mubr.msk.f32.gmra.mxu0 %vm1757_vm8, %v3346_v4  ;;  %vm1748_vm13 = vcmp.eq.s32.totalorder %v1743_v39, 2 }
 0x159   :  { %2374 = vmatmul.mubr.msk.f32.gmra.mxu1 %vm1757_vm8, %v3350_v54  ;;  %v1747_v36 = vsel %vm1745_vm9, %v3301_v35, %v918_v5  ;;  %vm917_vm14 = vcmp.eq.s32.totalorder %v915_v47, 0  ;;  %vm920_vm11 = vcmp.eq.s32.totalorder %v915_v47, 2  ;;  %2356 = vmatprep.mubr.msk.f32.mxu0 %vm1757_vm8, %v1443_v29  ;;  %vm809_vm15 = vweird.f32 %v2889_v1  ;;  %v2296_v54 = vld [vmem:[%s3509_s5] ss:$0 sm:$0xff] }
 0x15a   :  { %2376 = vmatprep.mubr.msk.f32.mxu1 %vm1757_vm8, %v612_v20  ;;  %v1750_v15 = vsel %vm1748_vm13, %v921_v2, %v3320_v63  ;;  %v919_v18 = vsel %vm917_vm14, %v3301_v35, %v918_v5  ;;  %v922_v43 = vsel %vm920_vm11, %v921_v2, %v3320_v63  ;;  %vm705_vm4 = vweird.f32 %v2667_v30  ;;  %v2300_v63 = vld [vmem:[%s3505_s1] sm:$0xff]  }
 0x15b   :  { %v1649_v48 = vsel %vm809_vm15, nan, %v1648_v11  ;;  %v820_v56 = vsel %vm809_vm15, nan, %v819_v42  ;;  %v1546_v13 = vsel %vm705_vm4, nan, %v1545_v50  ;;  %v716_v34 = vsel %vm705_vm4, nan, %v715_v40 }
 0x15c   :  { %vm1744_vm5 = vcmp.lt.s32.totalorder %v1743_v39, 2  ;;  %vm916_vm3 = vcmp.lt.s32.totalorder %v915_v47, 2  ;;  %2357 = vmatmul.mubr.msk.f32.gmra.mxu0 %vm1757_vm8, %v1546_v13  ;;  %vm913_vm0 = vweird.f32 %v2816_v6  ;;  %v2302_v53 = vunpack.c.h.bf16 %v2300_v63 }
 0x15d   :  { %2377 = vmatmul.mubr.msk.f32.gmra.mxu1 %vm1757_vm8, %v716_v34  ;;  %v1751_v0 = vsel %vm1744_vm5, %v1747_v36, %v1750_v15  ;;  %v923_v1 = vsel %vm916_vm3, %v919_v18, %v922_v43  ;;  %2359 = vmatprep.mubr.msk.f32.mxu0 %vm1757_vm8, %v1649_v48  ;;  %v2301_v37 = vunpack.c.l.bf16 %v2300_v63  ;;  %v2306_v26 = vunpack.c.h.bf16 %v2315_v57 }
 0x15e   :  { %2379 = vmatprep.mubr.msk.f32.mxu1 %vm1757_vm8, %v820_v56  ;;  %v1752_v35 = vsel %vm913_vm0, nan, %v1751_v0  ;;  %v924_v30 = vsel %vm913_vm0, nan, %v923_v1  ;;  %v2305_v17 = vunpack.c.l.bf16 %v2315_v57  ;;  %v2310_v19 = vunpack.c.h.bf16 %v2316_v24 }
 0x15f   :  { %v2309_v55 = vunpack.c.l.bf16 %v2316_v24  ;;  %v2314_v39 = vunpack.c.h.bf16 %v2317_v12  ;;  %v2313_v16 = vunpack.c.l.bf16 %v2317_v12 }
 0x160   :  { %2360 = vmatmul.mubr.msk.f32.gmra.mxu0 %vm1757_vm8, %v1752_v35 }
 0x161   :  { %2380 = vmatmul.mubr.msk.f32.gmra.mxu1 %vm1757_vm8, %v924_v30  ;;  %vm2057_vm8 = vcmask 523264  }
 0x214   :  { %v2352_v8 = vpop.f32.mrf.mxu0 }
 0x215   :  { %v2372_v7 = vpop.f32.mrf.mxu1 }
 0x216   :  { %v1983_v3 = vadd.f32 %v2372_v7, %v2352_v8  ;;  %v1848_v6 = vpop.f32.mrf.mxu0 }
 0x217   :  { %v1977_v4 = vpop.f32.mrf.mxu1 }
 0x218   :  { %v2033_v44 = vadd.f32 %v2302_v53, %v1983_v3  ;;  %v1978_v60 = vadd.f32 %v1977_v4, %v1848_v6  ;;  %v2355_v46 = vpop.f32.mrf.mxu0 }
 0x219   :  { %v2375_v52 = vpop.f32.mrf.mxu1 }
 0x21a   :  { %v2032_v62 = vadd.f32 %v2301_v37, %v1978_v60  ;;  %v1993_v38 = vadd.f32 %v2375_v52, %v2355_v46  ;;  %v2048_v61 = vadd.f32 %v2296_v54, %v2033_v44  ;;  %v1858_v32 = vpop.f32.mrf.mxu0 }
 0x21b   :  { %v1987_v22 = vpop.f32.mrf.mxu1 }
 0x21c   :  { %v2035_v25 = vadd.f32 %v2306_v26, %v1993_v38  ;;  %v1988_v10 = vadd.f32 %v1987_v22, %v1858_v32  ;;  %v2061_v21 = vsel %vm2057_vm8, %v2048_v61, 0.0  ;;  %v2047_v41 = vadd.f32 %v2296_v54, %v2032_v62  ;;  %v2358_v14 = vpop.f32.mrf.mxu0 }
 0x21d   :  { %2062 = vadd.xlane.f32.xlu1 %v2061_v21  ;;  %v2378_v31 = vpop.f32.mrf.mxu1 }
 0x21e   :  { %v2034_v59 = vadd.f32 %v2305_v17, %v1988_v10  ;;  %v2003_v33 = vadd.f32 %v2378_v31, %v2358_v14  ;;  %v2058_v51 = vsel %vm2057_vm8, %v2047_v41, 0.0  ;;  %v2050_v45 = vadd.f32 %v2296_v54, %v2035_v25  ;;  %v1868_v28 = vpop.f32.mrf.mxu0 }
 0x21f   :  { %2059 = vadd.xlane.f32.xlu0 %v2058_v51  ;;  %v1997_v5 = vpop.f32.mrf.mxu1 }
 0x220   :  { %v1998_v27 = vadd.f32 %v1997_v5, %v1868_v28  ;;  %v2361_v58 = vpop.f32.mrf.mxu0  ;;  %v2049_v9 = vadd.f32 %v2296_v54, %v2034_v59  ;;  %v2037_v23 = vadd.f32 %v2310_v19, %v2003_v33  ;;  %v2067_v20 = vsel %vm2057_vm8, %v2050_v45, 0.0 }
 0x221   :  { %v2381_v49 = vpop.f32.mrf.mxu1 }
 0x222   :  { %v2036_v47 = vadd.f32 %v2309_v55, %v1998_v27  ;;  %v2013_v29 = vadd.f32 %v2381_v49, %v2361_v58  ;;  %v1878_v2 = vpop.f32.mrf.mxu0  ;;  %v2064_v42 = vsel %vm2057_vm8, %v2049_v9, 0.0  ;;  %v2052_v43 = vadd.f32 %v2296_v54, %v2037_v23 }
 0x223   :  { %2068 = vadd.xlane.f32.xlu0 %v2067_v20  ;;  %v2007_v50 = vpop.f32.mrf.mxu1 }
 0x224   :  { %v2008_v40 = vadd.f32 %v2007_v50, %v1878_v2  ;;  %v2051_v11 = vadd.f32 %v2296_v54, %v2036_v47  ;;  %v2039_v36 = vadd.f32 %v2314_v39, %v2013_v29  ;;  %v2073_v56 = vsel %vm2057_vm8, %v2052_v43, 0.0 }
 0x226   :  { %v2038_v15 = vadd.f32 %v2313_v16, %v2008_v40  ;;  %v2070_v18 = vsel %vm2057_vm8, %v2051_v11, 0.0  ;;  %v2054_v34 = vadd.f32 %v2296_v54, %v2039_v36 }
 0x227   :  { %2065 = vadd.xlane.f32.xlu0 %v2064_v42  ;;  %2071 = vadd.xlane.f32.xlu1 %v2070_v18 }
 0x228   :  { %v2053_v48 = vadd.f32 %v2296_v54, %v2038_v15  ;;  %v2079_v0 = vsel %vm2057_vm8, %v2054_v34, 0.0 }
 0x22a   :  { %v2076_v13 = vsel %vm2057_vm8, %v2053_v48, 0.0 }
 0x22b   :  { %2074 = vadd.xlane.f32.xlu0 %v2073_v56  ;;  %2077 = vadd.xlane.f32.xlu1 %v2076_v13 }
 0x22f   :  { %2080 = vadd.xlane.f32.xlu0 %v2079_v0 }
 0x2a6   :  { %v2063_v1 = vpop.xlane.xlu1 %2062 }
 0x2a7   :  { %v2084_v35 = vmul.f32 0.015625, %v2063_v1 }
 0x2a8   :  { %v2060_v30 = vpop.xlane.xlu0 %2059 }
 0x2a9   :  { %v3439_v63 = vsub.f32 %v2048_v61, %v2084_v35  ;;  %v2083_v53 = vmul.f32 0.015625, %v2060_v30  ;;  %v2298_v30 = vld [vmem:[%s3511_s7] ss:$0 sm:$0xff] }
 0x2ab   :  { %v3441_v8 = vsub.f32 %v2047_v41, %v2083_v53  ;;  %v2100_v7 = vmul.f32 %v3439_v63, %v3439_v63 }
 0x2ac   :  { %v2069_v57 = vpop.xlane.xlu0 %2068 }
 0x2ad   :  { %v2086_v3 = vmul.f32 0.015625, %v2069_v57  ;;  %v2110_v37 = vsel %vm2057_vm8, %v2100_v7, 0.0  ;;  %v2099_v6 = vmul.f32 %v3441_v8, %v3441_v8 }
 0x2ae   :  { %2111 = vadd.xlane.f32.xlu0 %v2110_v37 }
 0x2af   :  { %v3448_v4 = vsub.f32 %v2050_v45, %v2086_v3  ;;  %v2107_v54 = vsel %vm2057_vm8, %v2099_v6, 0.0 }
 0x2b0   :  { %v2072_v44 = vpop.xlane.xlu1 %2071  ;;  %2108 = vadd.xlane.f32.xlu1 %v2107_v54  ;;  %v2066_v60 = vpop.xlane.xlu0 %2065 }
 0x2b1   :  { %v2087_v26 = vmul.f32 0.015625, %v2072_v44  ;;  %v2085_v46 = vmul.f32 0.015625, %v2066_v60  ;;  %v2102_v52 = vmul.f32 %v3448_v4, %v3448_v4 }
 0x2b3   :  { %v3453_v62 = vsub.f32 %v2051_v11, %v2087_v26  ;;  %v3455_v38 = vsub.f32 %v2049_v9, %v2085_v46  ;;  %v2116_v17 = vsel %vm2057_vm8, %v2102_v52, 0.0 }
 0x2b4   :  { %v2078_v61 = vpop.xlane.xlu1 %2077  ;;  %2117 = vadd.xlane.f32.xlu0 %v2116_v17  ;;  %v2075_v24 = vpop.xlane.xlu0 %2074 }
 0x2b5   :  { %v2089_v32 = vmul.f32 0.015625, %v2078_v61  ;;  %v2088_v22 = vmul.f32 0.015625, %v2075_v24  ;;  %v2101_v25 = vmul.f32 %v3455_v38, %v3455_v38  ;;  %v2103_v14 = vmul.f32 %v3453_v62, %v3453_v62 }
 0x2b7   :  { %v3460_v10 = vsub.f32 %v2053_v48, %v2089_v32  ;;  %v3462_v21 = vsub.f32 %v2052_v43, %v2088_v22  ;;  %v2113_v41 = vsel %vm2057_vm8, %v2101_v25, 0.0  ;;  %v2119_v33 = vsel %vm2057_vm8, %v2103_v14, 0.0  ;;  %v2297_v48 = vld [vmem:[%s3510_s6] ss:$0 sm:$0xff]  ;;  %s2503_s6 = smov [#allocation2]  }
 0x2b8   :  { %2114 = vadd.xlane.f32.xlu1 %v2113_v41  ;;  %v2081_v31 = vpop.xlane.xlu0 %2080  ;;  %s2204_s7 = sshll.u32 %s2503_s6, 4  ;;  %s2205_s7 = int_to_ptr.vmem [resolvable:$true] %s2204_s7 }
 0x2b9   :  { %v2090_v19 = vmul.f32 0.015625, %v2081_v31  ;;  %v2104_v55 = vmul.f32 %v3462_v21, %v3462_v21  ;;  %v2105_v12 = vmul.f32 %v3460_v10, %v3460_v10  ;;  %s2474_s23 = scalar_lea.vmem %s2205_s7, 1024  ;;  %p2479_p1 = scmp.lt.s32.totalorder %s2205_s7, %s2205_s7 }
 0x2ba   :  { %p2475_p0 = scmp.ne.s32.totalorder %s2205_s7, %s2474_s23  ;;  %p2480_p2 = scmp.lt.s32.totalorder %s2474_s23, %s2474_s23 }
 0x2bb   :  { %v3469_v59 = vsub.f32 %v2054_v34, %v2090_v19  ;;  %v2122_v51 = vsel %vm2057_vm8, %v2104_v55, 0.0  ;;  %v2125_v28 = vsel %vm2057_vm8, %v2105_v12, 0.0 }
 0x2bc   :  { %2120 = vadd.xlane.f32.xlu1 %v2119_v33  ;;  %2123 = vadd.xlane.f32.xlu0 %v2122_v51  ;;  %p2481_p3 = por %p2480_p2, %p2479_p1 }
 0x2bd   :  { %v2106_v45 = vmul.f32 %v3469_v59, %v3469_v59 }
 0x2be   :  { %p2482_p4 = pnand %p2481_p3, %p2475_p0 }
 0x2bf   :  { %v2128_v5 = vsel %vm2057_vm8, %v2106_v45, 0.0 }
 0x2c0   :  { %2126 = vadd.xlane.f32.xlu1 %v2125_v28  ;;  %2129 = vadd.xlane.f32.xlu0 %v2128_v5 }
 0x337   :  { %v2112_v27 = vpop.xlane.xlu0 %2111 }
 0x338   :  { %v2132_v58 = vmul.f32 0.015625, %v2112_v27 }
 0x339   :  { %v2109_v49 = vpop.xlane.xlu1 %2108 }
 0x33a   :  { %v2140_v39 = vadd.f32 1e-05, %v2132_v58  ;;  %v2131_v16 = vmul.f32 0.015625, %v2109_v49 }
 0x33c   :  { %2458 = vrsqrt.f32 %v2140_v39  ;;  %v2139_v9 = vadd.f32 1e-05, %v2131_v16 }
 0x33d   :  { %v2118_v23 = vpop.xlane.xlu0 %2117 }
 0x33e   :  { %2460 = vrsqrt.f32 %v2139_v9  ;;  %v2134_v47 = vmul.f32 0.015625, %v2118_v23 }
 0x340   :  { %v2142_v29 = vadd.f32 1e-05, %v2134_v47 }
 0x341   :  { %v2115_v20 = vpop.xlane.xlu1 %2114 }
 0x342   :  { %2462 = vrsqrt.f32 %v2142_v29  ;;  %v2133_v2 = vmul.f32 0.015625, %v2115_v20 }
 0x344   :  { %v2141_v50 = vadd.f32 1e-05, %v2133_v2 }
 0x345   :  { %v2121_v40 = vpop.xlane.xlu1 %2120  ;;  %v2124_v11 = vpop.xlane.xlu0 %2123 }
 0x346   :  { %2464 = vrsqrt.f32 %v2141_v50  ;;  %v2135_v42 = vmul.f32 0.015625, %v2121_v40  ;;  %v2136_v36 = vmul.f32 0.015625, %v2124_v11 }
 0x348   :  { %v2143_v15 = vadd.f32 1e-05, %v2135_v42  ;;  %v2144_v18 = vadd.f32 1e-05, %v2136_v36 }
 0x349   :  { %v2459_v43 = vpop.eup %2458  ;;  %v2127_v56 = vpop.xlane.xlu1 %2126 }
 0x34a   :  { %v2130_v13 = vpop.xlane.xlu0 %2129  ;;  %v2156_v34 = vmul.f32 %v2459_v43, %v3439_v63  ;;  %2466 = vrsqrt.f32 %v2143_v15  ;;  %v2137_v0 = vmul.f32 0.015625, %v2127_v56 }
 0x34b   :  { %v2138_v1 = vmul.f32 0.015625, %v2130_v13  ;;  %v2461_v35 = vpop.eup %2460  ;;  %2468 = vrsqrt.f32 %v2144_v18 }
 0x34c   :  { %v2170_v53 = vmul.f32 %v2297_v48, %v2156_v34  ;;  %v2155_v7 = vmul.f32 %v2461_v35, %v3441_v8  ;;  %v2145_v57 = vadd.f32 1e-05, %v2137_v0 }
 0x34d   :  { %v2146_v3 = vadd.f32 1e-05, %v2138_v1 }
 0x34e   :  { %v2184_v37 = vadd.f32 %v2298_v30, %v2170_v53  ;;  %v2169_v6 = vmul.f32 %v2297_v48, %v2155_v7  ;;  %2470 = vrsqrt.f32 %v2145_v57 }
 0x34f   :  { %v2463_v54 = vpop.eup %2462  ;;  %2472 = vrsqrt.f32 %v2146_v3 }
 0x350   :  { %2192 = vst.msk [vmem:[#allocation2 + $0x8] sm:$0xff] %vm2057_vm8, %v2184_v37  ;;  %v2183_v63 = vadd.f32 %v2298_v30, %v2169_v6  ;;  %v2158_v44 = vmul.f32 %v2463_v54, %v3448_v4 }
 0x352   :  { %2191 = vst.msk [vmem:[#allocation2] sm:$0xff] %vm2057_vm8, %v2183_v63  ;;  %v2172_v60 = vmul.f32 %v2297_v48, %v2158_v44 }
 0x353   :  { %v2465_v26 = vpop.eup %2464 }
 0x354   :  { %v2186_v46 = vadd.f32 %v2298_v30, %v2172_v60  ;;  %v2157_v52 = vmul.f32 %v2465_v26, %v3455_v38 }
 0x356   :  { %2194 = vst.msk [vmem:[#allocation2 + $0x18] sm:$0xff] %vm2057_vm8, %v2186_v46  ;;  %v2171_v8 = vmul.f32 %v2297_v48, %v2157_v52 }
 0x357   :  { %v2467_v17 = vpop.eup %2466 }
 0x358   :  { %v2469_v61 = vpop.eup %2468  ;;  %v2185_v24 = vadd.f32 %v2298_v30, %v2171_v8  ;;  %v2159_v32 = vmul.f32 %v2467_v17, %v3453_v62 }
 0x359   :  { %v2160_v22 = vmul.f32 %v2469_v61, %v3462_v21 }
 0x35a   :  { %2193 = vst.msk [vmem:[#allocation2 + $0x10] sm:$0xff] %vm2057_vm8, %v2185_v24  ;;  %v2173_v4 = vmul.f32 %v2297_v48, %v2159_v32 }
 0x35b   :  { %v2471_v25 = vpop.eup %2470  ;;  %v2174_v41 = vmul.f32 %v2297_v48, %v2160_v22 }
 0x35c   :  { %v2473_v14 = vpop.eup %2472  ;;  %v2187_v31 = vadd.f32 %v2298_v30, %v2173_v4  ;;  %v2161_v19 = vmul.f32 %v2471_v25, %v3460_v10 }
 0x35d   :  { %v2188_v38 = vadd.f32 %v2298_v30, %v2174_v41  ;;  %v2162_v55 = vmul.f32 %v2473_v14, %v3469_v59 }
 0x35e   :  { %2195 = vst.msk [vmem:[#allocation2 + $0x20] sm:$0xff] %vm2057_vm8, %v2187_v31  ;;  %v2175_v33 = vmul.f32 %v2297_v48, %v2161_v19 }
 0x35f   :  { %2196 = vst.msk [vmem:[#allocation2 + $0x28] sm:$0xff] %vm2057_vm8, %v2188_v38  ;;  %v2176_v62 = vmul.f32 %v2297_v48, %v2162_v55 }
 0x360   :  { %v2189_v21 = vadd.f32 %v2298_v30, %v2175_v33 }
 0x361   :  { %v2190_v51 = vadd.f32 %v2298_v30, %v2176_v62 }
 0x362   :  { %2197 = vst.msk [vmem:[#allocation2 + $0x30] sm:$0xff] %vm2057_vm8, %v2189_v21 }
 0x363   :  { %2198 = vst.msk [vmem:[#allocation2 + $0x38] sm:$0xff] %vm2057_vm8, %v2190_v51 }
 0x364   :  { %2485 = shalt.err (!%p2482_p4)
}
 0x365   :  { %s2504_s24 = smov 128   ;;  %s2505_s25 = smov 8  }
 0x366   :  { %2210 = dma.vmem_to_hbm [thread:$0]  %s2205_s7, 1024, %s3512_s8, [#allocation3], %s2504_s24, %s2504_s24, %s2505_s25  }
 0x367   :  { %2494 = dma.done.wait [#allocation3], 1024  }
 0x368   :  { %2495 = vsyncadd [#allocation3], 4294966272 }
 0x369   :  { %2214 = vsyncpa [#allocation3], 1 }

</bundles_post_ra>
